<compile_context>
chip_gen: v7x
topology: tpu7x:2x2x1
jax: 0.10.0
libtpu: 0.0.40
codegen_flags: <defaults>
</compile_context>

<pallas_src>
import numpy as np
import jax
import jax.numpy as jnp
from jax.experimental import pallas as pl
from jax.experimental.pallas import tpu as pltpu


# -------------------------------------------------------------------------------------
# One-time, host-side (numpy) weight algebra.  Call once per parameter set.
# -------------------------------------------------------------------------------------
def build_decoder_constants(p, x_shape, skip_shape):
    f32 = np.float32
    B, Cin, Hin, Win = x_shape
    Bs, Cs, Hs, Ws = skip_shape
    Cu = np.asarray(p["up_w"]).shape[1]
    Co = np.asarray(p["c1_w"]).shape[0]
    dy, dx = Hs - 2 * Hin, Ws - 2 * Win
    # TODO(synk): negative diffs (skip smaller than the upsampled map) would need cropping.
    assert dy >= 0 and dx >= 0 and B == Bs
    dy_t, dx_l = dy // 2, dx // 2

    CX = B * Win * Cin
    CU = B * Ws * Cu
    CS = B * Ws * Cs
    CO = B * Ws * Co

    eyeB = np.eye(B, dtype=f32)

    # --- ConvTranspose2d(k=2,s=2) as two banded matrices (even/odd output rows),
    #     concatenated along N so the kernel does one (Hin,CX)x(CX,2*CU) dot.
    Wt = np.asarray(p["up_w"], f32)                        # (Cin, Cu, 2, 2)
    jin = np.arange(Win)[:, None]
    jout = np.arange(Ws)[None, :]
    Us = []
    for kh in range(2):
        M = np.zeros((Win, Cin, Ws, Cu), f32)
        for kw in range(2):
            hit = (jout == dx_l + 2 * jin + kw).astype(f32)          # (Win, Ws)
            M += hit[:, None, :, None] * Wt[:, :, kh, kw][None, :, None, :]
        Us.append(np.kron(eyeB, M.reshape(Win * Cin, Ws * Cu)))
    Ucat = np.concatenate(Us, axis=1)                      # (CX, 2*CU)

    # ConvTranspose bias, masked to the columns that are not F.pad zero-padding
    col_j = (np.arange(CU) // Cu) % Ws
    in_up = ((col_j >= dx_l) & (col_j < dx_l + 2 * Win)).astype(f32)
    upb = (np.tile(np.asarray(p["up_b"], f32), B * Ws) * in_up).reshape(1, CU)

    # Merged even/odd row-interleave permutation, applied to the stacked [up_e; up_o]
    Pcomb = np.zeros((2 * Hin, 2 * Hin), f32)
    Pcomb[2 * np.arange(Hin), np.arange(Hin)] = 1.0
    Pcomb[2 * np.arange(Hin) + 1, Hin + np.arange(Hin)] = 1.0

    # --- 3x3 conv as banded matrices; the three kh row taps are concatenated along the
    #     contraction dim so each conv is ONE deep-K dot in the kernel.
    def band(K):                                           # K: (Co, Ci, 3, 3)
        Ci = K.shape[1]
        d = np.arange(Ws)[:, None] - np.arange(Ws)[None, :] + 1      # kw = jin - jout + 1
        mask = ((d >= 0) & (d <= 2)).astype(f32)
        dcl = np.clip(d, 0, 2)
        Ts = []
        for kh in range(3):
            sel = K[:, :, kh, :][:, :, dcl] * mask[None, None]       # (Co, Ci, Ws, Ws)
            Tm = np.transpose(sel, (2, 1, 3, 0)).reshape(Ws * Ci, Ws * Co)
            Ts.append(np.kron(eyeB, Tm))
        return Ts                                          # 3 x (B*Ws*Ci, CO)

    c1w = np.asarray(p["c1_w"], f32)
    assert c1w.shape[1] == Cu + Cs
    T1u = band(c1w[:, :Cu])        # conv1 on the upsampled half of the (virtual) concat
    T1s = band(c1w[:, Cu:])        # conv1 on the skip half
    T2 = band(np.asarray(p["c2_w"], f32))
    W1cat = np.concatenate(T1u + T1s, axis=0)              # (3*(CU+CS), CO)
    W2cat = np.concatenate(T2, axis=0)                     # (3*CO, CO)
    # NOTE: c1_b / c2_b intentionally unused: training-mode BN removes the batch mean,
    # which cancels a per-channel conv bias exactly.

    # per-channel fold / broadcast helpers and pre-broadcast BN affine params
    S = np.tile(np.eye(Co, dtype=f32), (B * Ws, 1))        # (CO, Co)
    ST = S.T.copy()                                        # (Co, CO)
    bn = np.stack([np.tile(np.asarray(p["bn1_g"], f32), B * Ws),
                   np.tile(np.asarray(p["bn1_b"], f32), B * Ws),
                   np.tile(np.asarray(p["bn2_g"], f32), B * Ws),
                   np.tile(np.asarray(p["bn2_b"], f32), B * Ws)])    # (4, CO)

    bf16 = jnp.bfloat16
    return {
        "ucat": jnp.asarray(Ucat).astype(bf16),
        "upb": jnp.asarray(upb),
        "pcomb": jnp.asarray(Pcomb),
        "w1cat": jnp.asarray(W1cat).astype(bf16),
        "w2cat": jnp.asarray(W2cat).astype(bf16),
        "s": jnp.asarray(S),
        "st": jnp.asarray(ST),
        "bn": jnp.asarray(bn),
    }


# -------------------------------------------------------------------------------------
# Jitted forward: tiny relayouts + one fused Pallas kernel.
# -------------------------------------------------------------------------------------
@jax.jit
def conv_decoder_forward(x_nchw, skip_nchw, consts):
    f32 = jnp.float32
    bf16 = jnp.bfloat16
    x = x_nchw.astype(f32)
    skip = skip_nchw.astype(f32)
    B, Cin, Hin, Win = x.shape
    Bs, Cs, Hs, Ws = skip.shape
    Co = consts["s"].shape[1]
    Cu = consts["upb"].shape[1] // (B * Ws)
    dy = Hs - 2 * Hin
    dy_t = dy // 2

    CX = B * Win * Cin                      # lane width of x in the (row, b*w*c) layout
    CU = B * Ws * Cu                        # lane width of the upsampled activation
    CS = B * Ws * Cs                        # lane width of skip
    CO = B * Ws * Co                        # lane width of conv outputs

    # NCHW -> lane-dense (spatial_row, b*w*c) relayout (tiny)
    x_lay = jnp.transpose(x, (2, 0, 3, 1)).reshape(Hin, CX).astype(bf16)
    skip_pad = jnp.pad(jnp.transpose(skip, (2, 0, 3, 1)).reshape(Hs, CS),
                       ((1, 1), (0, 0)))    # +1-row halo for the 3x3 row taps

    inv_cnt = 1.0 / float(B * Hs * Ws)
    eps = 1e-5
    HI = jax.lax.Precision.HIGHEST

    def kernel(x_ref, skip_ref, ucat_ref, upb_ref, pcomb_ref,
               w1_ref, w2_ref, s_ref, st_ref, bn_ref,
               out_ref, up_pad, a1_pad):
        # ---- ConvTranspose2d (k=2,s=2): one N=2*CU dot + one merged interleave dot ----
        up_eo = jnp.dot(x_ref[...], ucat_ref[...],
                        preferred_element_type=f32)                        # (Hin, 2*CU)
        stacked = jnp.concatenate([up_eo[:, :CU], up_eo[:, CU:]], axis=0)  # (2Hin, CU)
        interior = (jnp.dot(pcomb_ref[...], stacked, preferred_element_type=f32)
                    + upb_ref[...])

        # halo-only zero fill (F.pad rows + 3x3 row halo); interior written once
        up_pad[pl.ds(0, 1 + dy_t), :] = jnp.zeros((1 + dy_t, CU), f32)
        up_pad[pl.ds(1 + dy_t, 2 * Hin), :] = interior
        up_pad[pl.ds(1 + dy_t + 2 * Hin, 1 + dy - dy_t), :] = (
            jnp.zeros((1 + dy - dy_t, CU), f32))

        # ---- fused BatchNorm (batch stats, two-pass variance) + LeakyReLU(0.01) ----
        def bn_lrelu(y, g_b, b_b):
            # per-channel fold/broadcast via tiny HIGHEST-precision MXU dots (f32 stats)
            mean = jnp.dot(jnp.sum(y, axis=0, keepdims=True), s_ref[...],
                           precision=HI, preferred_element_type=f32) * inv_cnt  # (1, Co)
            yc = y - jnp.dot(mean, st_ref[...], precision=HI,
                             preferred_element_type=f32)
            var = jnp.dot(jnp.sum(yc * yc, axis=0, keepdims=True), s_ref[...],
                          precision=HI, preferred_element_type=f32) * inv_cnt   # (1, Co)
            var_b = jnp.dot(var, st_ref[...], precision=HI,
                            preferred_element_type=f32)                         # (1, CO)
            z = yc * (g_b * jax.lax.rsqrt(var_b + eps)) + b_b
            return jnp.where(z > 0, z, 0.01 * z)

        # ---- conv1 over cat([up, skip], channels): ONE deep-K dot (K = 3*(CU+CS)) ----
        lhs1 = jnp.concatenate(
            [up_pad[pl.ds(kh, Hs), :] for kh in range(3)]
            + [skip_ref[pl.ds(kh, Hs), :] for kh in range(3)], axis=1).astype(bf16)
        y1 = jnp.dot(lhs1, w1_ref[...], preferred_element_type=f32)          # (Hs, CO)

        a1_pad[pl.ds(0, 1), :] = jnp.zeros((1, CO), f32)
        a1_pad[pl.ds(1, Hs), :] = bn_lrelu(y1, bn_ref[0:1, :], bn_ref[1:2, :])
        a1_pad[pl.ds(1 + Hs, 1), :] = jnp.zeros((1, CO), f32)

        # ---- conv2: ONE deep-K dot (K = 3*CO) over the activated conv1 output ----
        lhs2 = jnp.concatenate([a1_pad[pl.ds(kh, Hs), :] for kh in range(3)],
                               axis=1).astype(bf16)
        y2 = jnp.dot(lhs2, w2_ref[...], preferred_element_type=f32)
        out_ref[...] = bn_lrelu(y2, bn_ref[2:3, :], bn_ref[3:4, :])

    full = lambda shape: pl.BlockSpec(shape, lambda i, _s=shape: (0,) * len(_s))
    out_lay = pl.pallas_call(
        kernel,
        out_shape=jax.ShapeDtypeStruct((Hs, CO), f32),
        grid_spec=pltpu.PrefetchScalarGridSpec(
            num_scalar_prefetch=0,
            grid=(1,),
            in_specs=[full((Hin, CX)), full((Hs + 2, CS)), full((CX, 2 * CU)),
                      full((1, CU)), full((2 * Hin, 2 * Hin)),
                      full((3 * (CU + CS), CO)), full((3 * CO, CO)),
                      full((CO, Co)), full((Co, CO)), full((4, CO))],
            out_specs=full((Hs, CO)),
            scratch_shapes=[pltpu.VMEM((Hs + 2, CU), f32),   # up (padded) with row halo
                            pltpu.VMEM((Hs + 2, CO), f32)]), # activated conv1 with halo
        compiler_params=pltpu.CompilerParams(
            dimension_semantics=("arbitrary",)),
    )(x_lay, skip_pad, consts["ucat"], consts["upb"], consts["pcomb"],
      consts["w1cat"], consts["w2cat"], consts["s"], consts["st"], consts["bn"])

    # (Hs, b*w*c) -> NCHW
    return jnp.transpose(out_lay.reshape(Hs, B, Ws, Co), (1, 3, 0, 2))


# ------------------------------------ Reference -------------------------------------

def reference_forward(x, skip, p):
    """Pure JAX/numpy NCHW reference mirroring the PyTorch module (training-mode BN)."""
    x = np.asarray(x, np.float32)
    skip = np.asarray(skip, np.float32)
    w = np.asarray(p["up_w"]); b = np.asarray(p["up_b"])
    B, Cin, H, W = x.shape
    Cout = w.shape[1]
    up = np.zeros((B, Cout, 2 * H, 2 * W), np.float32)
    for kh in range(2):
        for kw in range(2):
            up[:, :, kh::2, kw::2] = np.einsum("bchw,cd->bdhw", x, w[:, :, kh, kw])
    up += b.reshape(1, Cout, 1, 1)
    sh, sw = skip.shape[2:]
    uh, uw = up.shape[2:]
    dy, dx = sh - uh, sw - uw
    up = np.pad(up, ((0, 0), (0, 0), (dy // 2, dy - dy // 2), (dx // 2, dx - dx // 2)))
    z = np.concatenate([up, skip], axis=1)

    def conv_bn_lrelu(z, w, b, g, be):
        zj = jax.lax.conv_general_dilated(
            jnp.asarray(z), jnp.asarray(w), window_strides=(1, 1),
            padding=((1, 1), (1, 1)), dimension_numbers=("NCHW", "OIHW", "NCHW"),
            precision=jax.lax.Precision.HIGHEST)
        zj = zj + jnp.asarray(b).reshape(1, -1, 1, 1)
        mean = jnp.mean(zj, axis=(0, 2, 3), keepdims=True)
        var = jnp.mean((zj - mean) ** 2, axis=(0, 2, 3), keepdims=True)
        zj = ((zj - mean) / jnp.sqrt(var + 1e-5)
              * jnp.asarray(g).reshape(1, -1, 1, 1)
              + jnp.asarray(be).reshape(1, -1, 1, 1))
        return np.asarray(jnp.where(zj > 0, zj, 0.01 * zj))

    z = conv_bn_lrelu(z, p["c1_w"], p["c1_b"], p["bn1_g"], p["bn1_b"])
    z = conv_bn_lrelu(z, p["c2_w"], p["c2_b"], p["bn2_g"], p["bn2_b"])
    return z


# --------------------------------------- Main ----------------------------------------

if __name__ == "__main__":
    key = jax.random.PRNGKey(0)
    ks = jax.random.split(key, 10)

    Cin, Cout = 8, 4           # decoder: in_channels=8, out_channels=4
    B, H, W = 2, 8, 8          # x spatial; skip is 2x spatial with Cout channels

    x = jax.random.normal(ks[0], (B, Cin, H, W), jnp.float32)
    skip = jax.random.normal(ks[1], (B, Cout, 2 * H, 2 * W), jnp.float32)

    params = {
        "up_w": 0.1 * jax.random.normal(ks[2], (Cin, Cout, 2, 2), jnp.float32),
        "up_b": 0.1 * jax.random.normal(ks[3], (Cout,), jnp.float32),
        "c1_w": 0.1 * jax.random.normal(ks[4], (Cout, Cin, 3, 3), jnp.float32),
        "c1_b": 0.1 * jax.random.normal(ks[5], (Cout,), jnp.float32),
        "bn1_g": jnp.ones((Cout,), jnp.float32),
        "bn1_b": jnp.zeros((Cout,), jnp.float32),
        "c2_w": 0.1 * jax.random.normal(ks[6], (Cout, Cout, 3, 3), jnp.float32),
        "c2_b": 0.1 * jax.random.normal(ks[7], (Cout,), jnp.float32),
        "bn2_g": 1.0 + 0.1 * jax.random.normal(ks[8], (Cout,), jnp.float32),
        "bn2_b": 0.1 * jax.random.normal(ks[9], (Cout,), jnp.float32),
    }

    # One-time host-side weight algebra (hoisted out of the per-call forward path).
    consts = build_decoder_constants(params, x.shape, skip.shape)

    out = conv_decoder_forward(x, skip, consts)
    out = jax.block_until_ready(out)

    ref = reference_forward(x, skip, params)
    assert out.shape == ref.shape == (B, Cout, 2 * H, 2 * W), (out.shape, ref.shape)
    # Tolerance: conv matmuls run as bf16 MXU passes through two conv+BN stages; the
    # reference uses f32 HIGHEST, so allow ~2e-2 absolute/relative.
    np.testing.assert_allclose(np.asarray(out), ref, rtol=2e-2, atol=2e-2)

    print("KERNEL_OK")
</pallas_src>

<mosaic_0001>
module attributes {stable_mosaic.version = 11 : i64} {
  func.func @kernel(%arg0: i32, %arg1: memref<8x128xbf16, #tpu.memory_space<vmem>>, %arg2: memref<18x128xf32, #tpu.memory_space<vmem>>, %arg3: memref<128x256xbf16, #tpu.memory_space<vmem>>, %arg4: memref<1x128xf32, #tpu.memory_space<vmem>>, %arg5: memref<16x16xf32, #tpu.memory_space<vmem>>, %arg6: memref<768x128xbf16, #tpu.memory_space<vmem>>, %arg7: memref<384x128xbf16, #tpu.memory_space<vmem>>, %arg8: memref<128x4xf32, #tpu.memory_space<vmem>>, %arg9: memref<4x128xf32, #tpu.memory_space<vmem>>, %arg10: memref<4x128xf32, #tpu.memory_space<vmem>>, %arg11: memref<16x128xf32, #tpu.memory_space<vmem>>, %arg12: memref<18x128xf32, #tpu.memory_space<vmem>>, %arg13: memref<18x128xf32, #tpu.memory_space<vmem>>) attributes {dimension_semantics = [#tpu.dimension_semantics<arbitrary>], iteration_bounds = array<i64: 1>, scalar_prefetch = 0 : i64, scratch_operands = 2 : i64, tpu.core_type = #tpu.core_type<tc>, window_params = [{pipeline_mode = #tpu.pipeline_mode<synchronous>, transform_indices = @transform_0, window_bounds = array<i64: 8, 128>}, {pipeline_mode = #tpu.pipeline_mode<synchronous>, transform_indices = @transform_1, window_bounds = array<i64: 18, 128>}, {pipeline_mode = #tpu.pipeline_mode<synchronous>, transform_indices = @transform_2, window_bounds = array<i64: 128, 256>}, {pipeline_mode = #tpu.pipeline_mode<synchronous>, transform_indices = @transform_3, window_bounds = array<i64: 1, 128>}, {pipeline_mode = #tpu.pipeline_mode<synchronous>, transform_indices = @transform_4, window_bounds = array<i64: 16, 16>}, {pipeline_mode = #tpu.pipeline_mode<synchronous>, transform_indices = @transform_5, window_bounds = array<i64: 768, 128>}, {pipeline_mode = #tpu.pipeline_mode<synchronous>, transform_indices = @transform_6, window_bounds = array<i64: 384, 128>}, {pipeline_mode = #tpu.pipeline_mode<synchronous>, transform_indices = @transform_7, window_bounds = array<i64: 128, 4>}, {pipeline_mode = #tpu.pipeline_mode<synchronous>, transform_indices = @transform_8, window_bounds = array<i64: 4, 128>}, {pipeline_mode = #tpu.pipeline_mode<synchronous>, transform_indices = @transform_9, window_bounds = array<i64: 4, 128>}, {pipeline_mode = #tpu.pipeline_mode<synchronous>, transform_indices = @transform_10, window_bounds = array<i64: 16, 128>}]} {
    %c0 = arith.constant 0 : index
    %c0_0 = arith.constant 0 : index
    %0 = vector.load %arg1[%c0, %c0_0] : memref<8x128xbf16, #tpu.memory_space<vmem>>, vector<8x128xbf16>
    %c0_1 = arith.constant 0 : index
    %c0_2 = arith.constant 0 : index
    %1 = vector.load %arg3[%c0_1, %c0_2] : memref<128x256xbf16, #tpu.memory_space<vmem>>, vector<128x256xbf16>
    %cst = arith.constant dense<0.000000e+00> : vector<8x256xf32>
    %2 = tpu.matmul %0, %1, %cst {dimension_numbers = #tpu.dot_dimension_numbers<[1], [0], [0], [1], [0, 0, 1, 1], [], []>} : vector<8x128xbf16>, vector<128x256xbf16>, vector<8x256xf32> -> vector<8x256xf32>
    %3 = vector.extract_strided_slice %2 {offsets = [0, 0], sizes = [8, 128], strides = [1, 1]} : vector<8x256xf32> to vector<8x128xf32>
    %4 = vector.extract_strided_slice %2 {offsets = [0, 128], sizes = [8, 128], strides = [1, 1]} : vector<8x256xf32> to vector<8x128xf32>
    %5 = tpu.concatenate %3, %4 in 0 : vector<8x128xf32>, vector<8x128xf32> -> vector<16x128xf32>
    %c0_3 = arith.constant 0 : index
    %c0_4 = arith.constant 0 : index
    %6 = vector.load %arg5[%c0_3, %c0_4] : memref<16x16xf32, #tpu.memory_space<vmem>>, vector<16x16xf32>
    %cst_5 = arith.constant dense<0.000000e+00> : vector<16x128xf32>
    %7 = tpu.matmul %6, %5, %cst_5 {dimension_numbers = #tpu.dot_dimension_numbers<[1], [0], [0], [1], [0, 0, 1, 1], [], []>} : vector<16x16xf32>, vector<16x128xf32>, vector<16x128xf32> -> vector<16x128xf32>
    %c0_6 = arith.constant 0 : index
    %c0_7 = arith.constant 0 : index
    %8 = vector.load %arg4[%c0_6, %c0_7] : memref<1x128xf32, #tpu.memory_space<vmem>>, vector<1x128xf32>
    %9 = vector.broadcast %8 : vector<1x128xf32> to vector<16x128xf32>
    %10 = arith.addf %7, %9 : vector<16x128xf32>
    %cst_8 = arith.constant 0.000000e+00 : f32
    %11 = vector.broadcast %cst_8 : f32 to vector<1x128xf32>
    %c0_9 = arith.constant 0 : index
    %c0_10 = arith.constant 0 : index
    %12 = vector.load %arg12[%c0_9, %c0_10] : memref<18x128xf32, #tpu.memory_space<vmem>>, vector<1x128xf32>
    tpu.vector_store %arg12[%c0_9, %c0_10], %11 {strides = array<i32>} : memref<18x128xf32, #tpu.memory_space<vmem>>, vector<1x128xf32>,
    %c1 = arith.constant 1 : index
    %c0_11 = arith.constant 0 : index
    %13 = vector.load %arg12[%c1, %c0_11] : memref<18x128xf32, #tpu.memory_space<vmem>>, vector<16x128xf32>
    tpu.vector_store %arg12[%c1, %c0_11], %10 {strides = array<i32>} : memref<18x128xf32, #tpu.memory_space<vmem>>, vector<16x128xf32>,
    %cst_12 = arith.constant 0.000000e+00 : f32
    %14 = vector.broadcast %cst_12 : f32 to vector<1x128xf32>
    %c17 = arith.constant 17 : index
    %c0_13 = arith.constant 0 : index
    %15 = vector.load %arg12[%c17, %c0_13] : memref<18x128xf32, #tpu.memory_space<vmem>>, vector<1x128xf32>
    tpu.vector_store %arg12[%c17, %c0_13], %14 {strides = array<i32>} : memref<18x128xf32, #tpu.memory_space<vmem>>, vector<1x128xf32>,
    %c0_14 = arith.constant 0 : index
    %c0_15 = arith.constant 0 : index
    %16 = vector.load %arg12[%c0_14, %c0_15] : memref<18x128xf32, #tpu.memory_space<vmem>>, vector<16x128xf32>
    %c1_16 = arith.constant 1 : index
    %c0_17 = arith.constant 0 : index
    %17 = vector.load %arg12[%c1_16, %c0_17] : memref<18x128xf32, #tpu.memory_space<vmem>>, vector<16x128xf32>
    %c2 = arith.constant 2 : index
    %c0_18 = arith.constant 0 : index
    %18 = vector.load %arg12[%c2, %c0_18] : memref<18x128xf32, #tpu.memory_space<vmem>>, vector<16x128xf32>
    %c0_19 = arith.constant 0 : index
    %c0_20 = arith.constant 0 : index
    %19 = vector.load %arg2[%c0_19, %c0_20] : memref<18x128xf32, #tpu.memory_space<vmem>>, vector<16x128xf32>
    %c1_21 = arith.constant 1 : index
    %c0_22 = arith.constant 0 : index
    %20 = vector.load %arg2[%c1_21, %c0_22] : memref<18x128xf32, #tpu.memory_space<vmem>>, vector<16x128xf32>
    %c2_23 = arith.constant 2 : index
    %c0_24 = arith.constant 0 : index
    %21 = vector.load %arg2[%c2_23, %c0_24] : memref<18x128xf32, #tpu.memory_space<vmem>>, vector<16x128xf32>
    %22 = tpu.concatenate %16, %17, %18, %19, %20, %21 in 1 : vector<16x128xf32>, vector<16x128xf32>, vector<16x128xf32>, vector<16x128xf32>, vector<16x128xf32>, vector<16x128xf32> -> vector<16x768xf32>
    %23 = arith.truncf %22 : vector<16x768xf32> to vector<16x768xbf16>
    %c0_25 = arith.constant 0 : index
    %c0_26 = arith.constant 0 : index
    %24 = vector.load %arg6[%c0_25, %c0_26] : memref<768x128xbf16, #tpu.memory_space<vmem>>, vector<768x128xbf16>
    %cst_27 = arith.constant dense<0.000000e+00> : vector<16x128xf32>
    %25 = tpu.matmul %23, %24, %cst_27 {dimension_numbers = #tpu.dot_dimension_numbers<[1], [0], [0], [1], [0, 0, 1, 1], [], []>} : vector<16x768xbf16>, vector<768x128xbf16>, vector<16x128xf32> -> vector<16x128xf32>
    %cst_28 = arith.constant 0.000000e+00 : f32
    %26 = vector.broadcast %cst_28 : f32 to vector<1x128xf32>
    %c0_29 = arith.constant 0 : index
    %c0_30 = arith.constant 0 : index
    %27 = vector.load %arg13[%c0_29, %c0_30] : memref<18x128xf32, #tpu.memory_space<vmem>>, vector<1x128xf32>
    tpu.vector_store %arg13[%c0_29, %c0_30], %26 {strides = array<i32>} : memref<18x128xf32, #tpu.memory_space<vmem>>, vector<1x128xf32>,
    %c0_31 = arith.constant 0 : index
    %c0_32 = arith.constant 0 : index
    %28 = vector.load %arg10[%c0_31, %c0_32] : memref<4x128xf32, #tpu.memory_space<vmem>>, vector<1x128xf32>
    %c1_33 = arith.constant 1 : index
    %c0_34 = arith.constant 0 : index
    %29 = vector.load %arg10[%c1_33, %c0_34] : memref<4x128xf32, #tpu.memory_space<vmem>>, vector<1x128xf32>
    %cst_35 = arith.constant dense<0.000000e+00> : vector<128xf32>
    %30 = vector.multi_reduction <add>, %25, %cst_35 [0] : vector<16x128xf32> to vector<128xf32>
    %31 = vector.shape_cast %30 : vector<128xf32> to vector<1x128xf32>
    %c0_36 = arith.constant 0 : index
    %c0_37 = arith.constant 0 : index
    %32 = vector.load %arg8[%c0_36, %c0_37] : memref<128x4xf32, #tpu.memory_space<vmem>>, vector<128x4xf32>
    %cst_38 = arith.constant dense<0.000000e+00> : vector<1x4xf32>
    %33 = tpu.matmul %31, %32, %cst_38 {dimension_numbers = #tpu.dot_dimension_numbers<[1], [0], [0], [1], [0, 0, 1, 1], [], []>, precision = #tpu.contract_precision<fp32>} : vector<1x128xf32>, vector<128x4xf32>, vector<1x4xf32> -> vector<1x4xf32>
    %cst_39 = arith.constant 0.001953125 : f32
    %34 = vector.broadcast %cst_39 : f32 to vector<1x4xf32>
    %35 = arith.mulf %33, %34 : vector<1x4xf32>
    %c0_40 = arith.constant 0 : index
    %c0_41 = arith.constant 0 : index
    %36 = vector.load %arg9[%c0_40, %c0_41] : memref<4x128xf32, #tpu.memory_space<vmem>>, vector<4x128xf32>
    %cst_42 = arith.constant dense<0.000000e+00> : vector<1x128xf32>
    %37 = tpu.matmul %35, %36, %cst_42 {dimension_numbers = #tpu.dot_dimension_numbers<[1], [0], [0], [1], [0, 0, 1, 1], [], []>, precision = #tpu.contract_precision<fp32>} : vector<1x4xf32>, vector<4x128xf32>, vector<1x128xf32> -> vector<1x128xf32>
    %38 = vector.broadcast %37 : vector<1x128xf32> to vector<16x128xf32>
    %39 = arith.subf %25, %38 : vector<16x128xf32>
    %40 = arith.mulf %39, %39 : vector<16x128xf32>
    %cst_43 = arith.constant dense<0.000000e+00> : vector<128xf32>
    %41 = vector.multi_reduction <add>, %40, %cst_43 [0] : vector<16x128xf32> to vector<128xf32>
    %42 = vector.shape_cast %41 : vector<128xf32> to vector<1x128xf32>
    %c0_44 = arith.constant 0 : index
    %c0_45 = arith.constant 0 : index
    %43 = vector.load %arg8[%c0_44, %c0_45] : memref<128x4xf32, #tpu.memory_space<vmem>>, vector<128x4xf32>
    %cst_46 = arith.constant dense<0.000000e+00> : vector<1x4xf32>
    %44 = tpu.matmul %42, %43, %cst_46 {dimension_numbers = #tpu.dot_dimension_numbers<[1], [0], [0], [1], [0, 0, 1, 1], [], []>, precision = #tpu.contract_precision<fp32>} : vector<1x128xf32>, vector<128x4xf32>, vector<1x4xf32> -> vector<1x4xf32>
    %cst_47 = arith.constant 0.001953125 : f32
    %45 = vector.broadcast %cst_47 : f32 to vector<1x4xf32>
    %46 = arith.mulf %44, %45 : vector<1x4xf32>
    %c0_48 = arith.constant 0 : index
    %c0_49 = arith.constant 0 : index
    %47 = vector.load %arg9[%c0_48, %c0_49] : memref<4x128xf32, #tpu.memory_space<vmem>>, vector<4x128xf32>
    %cst_50 = arith.constant dense<0.000000e+00> : vector<1x128xf32>
    %48 = tpu.matmul %46, %47, %cst_50 {dimension_numbers = #tpu.dot_dimension_numbers<[1], [0], [0], [1], [0, 0, 1, 1], [], []>, precision = #tpu.contract_precision<fp32>} : vector<1x4xf32>, vector<4x128xf32>, vector<1x128xf32> -> vector<1x128xf32>
    %cst_51 = arith.constant 9.99999974E-6 : f32
    %49 = vector.broadcast %cst_51 : f32 to vector<1x128xf32>
    %50 = arith.addf %48, %49 : vector<1x128xf32>
    %51 = math.rsqrt %50 : vector<1x128xf32>
    %52 = arith.mulf %28, %51 : vector<1x128xf32>
    %53 = vector.broadcast %52 : vector<1x128xf32> to vector<16x128xf32>
    %54 = arith.mulf %39, %53 : vector<16x128xf32>
    %55 = vector.broadcast %29 : vector<1x128xf32> to vector<16x128xf32>
    %56 = arith.addf %54, %55 : vector<16x128xf32>
    %cst_52 = arith.constant 0.000000e+00 : f32
    %57 = vector.broadcast %cst_52 : f32 to vector<16x128xf32>
    %58 = arith.cmpf ogt, %56, %57 : vector<16x128xf32>
    %cst_53 = arith.constant 0.00999999977 : f32
    %59 = vector.broadcast %cst_53 : f32 to vector<16x128xf32>
    %60 = arith.mulf %59, %56 : vector<16x128xf32>
    %61 = arith.select %58, %56, %60 : vector<16x128xi1>, vector<16x128xf32>
    %c1_54 = arith.constant 1 : index
    %c0_55 = arith.constant 0 : index
    %62 = vector.load %arg13[%c1_54, %c0_55] : memref<18x128xf32, #tpu.memory_space<vmem>>, vector<16x128xf32>
    tpu.vector_store %arg13[%c1_54, %c0_55], %61 {strides = array<i32>} : memref<18x128xf32, #tpu.memory_space<vmem>>, vector<16x128xf32>,
    %cst_56 = arith.constant 0.000000e+00 : f32
    %63 = vector.broadcast %cst_56 : f32 to vector<1x128xf32>
    %c17_57 = arith.constant 17 : index
    %c0_58 = arith.constant 0 : index
    %64 = vector.load %arg13[%c17_57, %c0_58] : memref<18x128xf32, #tpu.memory_space<vmem>>, vector<1x128xf32>
    tpu.vector_store %arg13[%c17_57, %c0_58], %63 {strides = array<i32>} : memref<18x128xf32, #tpu.memory_space<vmem>>, vector<1x128xf32>,
    %c0_59 = arith.constant 0 : index
    %c0_60 = arith.constant 0 : index
    %65 = vector.load %arg13[%c0_59, %c0_60] : memref<18x128xf32, #tpu.memory_space<vmem>>, vector<16x128xf32>
    %c1_61 = arith.constant 1 : index
    %c0_62 = arith.constant 0 : index
    %66 = vector.load %arg13[%c1_61, %c0_62] : memref<18x128xf32, #tpu.memory_space<vmem>>, vector<16x128xf32>
    %c2_63 = arith.constant 2 : index
    %c0_64 = arith.constant 0 : index
    %67 = vector.load %arg13[%c2_63, %c0_64] : memref<18x128xf32, #tpu.memory_space<vmem>>, vector<16x128xf32>
    %68 = tpu.concatenate %65, %66, %67 in 1 : vector<16x128xf32>, vector<16x128xf32>, vector<16x128xf32> -> vector<16x384xf32>
    %69 = arith.truncf %68 : vector<16x384xf32> to vector<16x384xbf16>
    %c0_65 = arith.constant 0 : index
    %c0_66 = arith.constant 0 : index
    %70 = vector.load %arg7[%c0_65, %c0_66] : memref<384x128xbf16, #tpu.memory_space<vmem>>, vector<384x128xbf16>
    %cst_67 = arith.constant dense<0.000000e+00> : vector<16x128xf32>
    %71 = tpu.matmul %69, %70, %cst_67 {dimension_numbers = #tpu.dot_dimension_numbers<[1], [0], [0], [1], [0, 0, 1, 1], [], []>} : vector<16x384xbf16>, vector<384x128xbf16>, vector<16x128xf32> -> vector<16x128xf32>
    %c2_68 = arith.constant 2 : index
    %c0_69 = arith.constant 0 : index
    %72 = vector.load %arg10[%c2_68, %c0_69] : memref<4x128xf32, #tpu.memory_space<vmem>>, vector<1x128xf32>
    %c3 = arith.constant 3 : index
    %c0_70 = arith.constant 0 : index
    %73 = vector.load %arg10[%c3, %c0_70] : memref<4x128xf32, #tpu.memory_space<vmem>>, vector<1x128xf32>
    %cst_71 = arith.constant dense<0.000000e+00> : vector<128xf32>
    %74 = vector.multi_reduction <add>, %71, %cst_71 [0] : vector<16x128xf32> to vector<128xf32>
    %75 = vector.shape_cast %74 : vector<128xf32> to vector<1x128xf32>
    %c0_72 = arith.constant 0 : index
    %c0_73 = arith.constant 0 : index
    %76 = vector.load %arg8[%c0_72, %c0_73] : memref<128x4xf32, #tpu.memory_space<vmem>>, vector<128x4xf32>
    %cst_74 = arith.constant dense<0.000000e+00> : vector<1x4xf32>
    %77 = tpu.matmul %75, %76, %cst_74 {dimension_numbers = #tpu.dot_dimension_numbers<[1], [0], [0], [1], [0, 0, 1, 1], [], []>, precision = #tpu.contract_precision<fp32>} : vector<1x128xf32>, vector<128x4xf32>, vector<1x4xf32> -> vector<1x4xf32>
    %cst_75 = arith.constant 0.001953125 : f32
    %78 = vector.broadcast %cst_75 : f32 to vector<1x4xf32>
    %79 = arith.mulf %77, %78 : vector<1x4xf32>
    %c0_76 = arith.constant 0 : index
    %c0_77 = arith.constant 0 : index
    %80 = vector.load %arg9[%c0_76, %c0_77] : memref<4x128xf32, #tpu.memory_space<vmem>>, vector<4x128xf32>
    %cst_78 = arith.constant dense<0.000000e+00> : vector<1x128xf32>
    %81 = tpu.matmul %79, %80, %cst_78 {dimension_numbers = #tpu.dot_dimension_numbers<[1], [0], [0], [1], [0, 0, 1, 1], [], []>, precision = #tpu.contract_precision<fp32>} : vector<1x4xf32>, vector<4x128xf32>, vector<1x128xf32> -> vector<1x128xf32>
    %82 = vector.broadcast %81 : vector<1x128xf32> to vector<16x128xf32>
    %83 = arith.subf %71, %82 : vector<16x128xf32>
    %84 = arith.mulf %83, %83 : vector<16x128xf32>
    %cst_79 = arith.constant dense<0.000000e+00> : vector<128xf32>
    %85 = vector.multi_reduction <add>, %84, %cst_79 [0] : vector<16x128xf32> to vector<128xf32>
    %86 = vector.shape_cast %85 : vector<128xf32> to vector<1x128xf32>
    %c0_80 = arith.constant 0 : index
    %c0_81 = arith.constant 0 : index
    %87 = vector.load %arg8[%c0_80, %c0_81] : memref<128x4xf32, #tpu.memory_space<vmem>>, vector<128x4xf32>
    %cst_82 = arith.constant dense<0.000000e+00> : vector<1x4xf32>
    %88 = tpu.matmul %86, %87, %cst_82 {dimension_numbers = #tpu.dot_dimension_numbers<[1], [0], [0], [1], [0, 0, 1, 1], [], []>, precision = #tpu.contract_precision<fp32>} : vector<1x128xf32>, vector<128x4xf32>, vector<1x4xf32> -> vector<1x4xf32>
    %cst_83 = arith.constant 0.001953125 : f32
    %89 = vector.broadcast %cst_83 : f32 to vector<1x4xf32>
    %90 = arith.mulf %88, %89 : vector<1x4xf32>
    %c0_84 = arith.constant 0 : index
    %c0_85 = arith.constant 0 : index
    %91 = vector.load %arg9[%c0_84, %c0_85] : memref<4x128xf32, #tpu.memory_space<vmem>>, vector<4x128xf32>
    %cst_86 = arith.constant dense<0.000000e+00> : vector<1x128xf32>
    %92 = tpu.matmul %90, %91, %cst_86 {dimension_numbers = #tpu.dot_dimension_numbers<[1], [0], [0], [1], [0, 0, 1, 1], [], []>, precision = #tpu.contract_precision<fp32>} : vector<1x4xf32>, vector<4x128xf32>, vector<1x128xf32> -> vector<1x128xf32>
    %cst_87 = arith.constant 9.99999974E-6 : f32
    %93 = vector.broadcast %cst_87 : f32 to vector<1x128xf32>
    %94 = arith.addf %92, %93 : vector<1x128xf32>
    %95 = math.rsqrt %94 : vector<1x128xf32>
    %96 = arith.mulf %72, %95 : vector<1x128xf32>
    %97 = vector.broadcast %96 : vector<1x128xf32> to vector<16x128xf32>
    %98 = arith.mulf %83, %97 : vector<16x128xf32>
    %99 = vector.broadcast %73 : vector<1x128xf32> to vector<16x128xf32>
    %100 = arith.addf %98, %99 : vector<16x128xf32>
    %cst_88 = arith.constant 0.000000e+00 : f32
    %101 = vector.broadcast %cst_88 : f32 to vector<16x128xf32>
    %102 = arith.cmpf ogt, %100, %101 : vector<16x128xf32>
    %cst_89 = arith.constant 0.00999999977 : f32
    %103 = vector.broadcast %cst_89 : f32 to vector<16x128xf32>
    %104 = arith.mulf %103, %100 : vector<16x128xf32>
    %105 = arith.select %102, %100, %104 : vector<16x128xi1>, vector<16x128xf32>
    %c0_90 = arith.constant 0 : index
    %c0_91 = arith.constant 0 : index
    %106 = vector.load %arg11[%c0_90, %c0_91] : memref<16x128xf32, #tpu.memory_space<vmem>>, vector<16x128xf32>
    tpu.vector_store %arg11[%c0_90, %c0_91], %105 {strides = array<i32>} : memref<16x128xf32, #tpu.memory_space<vmem>>, vector<16x128xf32>,
    return
  }
  func.func @transform_0(%arg0: i32) -> (i32, i32) {
    %c0_i32 = arith.constant 0 : i32
    %c0_i32_0 = arith.constant 0 : i32
    %c0_i32_1 = arith.constant 0 : i32
    return %c0_i32, %c0_i32_0 : i32, i32
  }
  func.func @transform_1(%arg0: i32) -> (i32, i32) {
    %c0_i32 = arith.constant 0 : i32
    %c0_i32_0 = arith.constant 0 : i32
    %c0_i32_1 = arith.constant 0 : i32
    return %c0_i32, %c0_i32_0 : i32, i32
  }
  func.func @transform_2(%arg0: i32) -> (i32, i32) {
    %c0_i32 = arith.constant 0 : i32
    %c0_i32_0 = arith.constant 0 : i32
    %c0_i32_1 = arith.constant 0 : i32
    return %c0_i32, %c0_i32_0 : i32, i32
  }
  func.func @transform_3(%arg0: i32) -> (i32, i32) {
    %c0_i32 = arith.constant 0 : i32
    %c0_i32_0 = arith.constant 0 : i32
    %c0_i32_1 = arith.constant 0 : i32
    return %c0_i32, %c0_i32_0 : i32, i32
  }
  func.func @transform_4(%arg0: i32) -> (i32, i32) {
    %c0_i32 = arith.constant 0 : i32
    %c0_i32_0 = arith.constant 0 : i32
    %c0_i32_1 = arith.constant 0 : i32
    return %c0_i32, %c0_i32_0 : i32, i32
  }
  func.func @transform_5(%arg0: i32) -> (i32, i32) {
    %c0_i32 = arith.constant 0 : i32
    %c0_i32_0 = arith.constant 0 : i32
    %c0_i32_1 = arith.constant 0 : i32
    return %c0_i32, %c0_i32_0 : i32, i32
  }
  func.func @transform_6(%arg0: i32) -> (i32, i32) {
    %c0_i32 = arith.constant 0 : i32
    %c0_i32_0 = arith.constant 0 : i32
    %c0_i32_1 = arith.constant 0 : i32
    return %c0_i32, %c0_i32_0 : i32, i32
  }
  func.func @transform_7(%arg0: i32) -> (i32, i32) {
    %c0_i32 = arith.constant 0 : i32
    %c0_i32_0 = arith.constant 0 : i32
    %c0_i32_1 = arith.constant 0 : i32
    return %c0_i32, %c0_i32_0 : i32, i32
  }
  func.func @transform_8(%arg0: i32) -> (i32, i32) {
    %c0_i32 = arith.constant 0 : i32
    %c0_i32_0 = arith.constant 0 : i32
    %c0_i32_1 = arith.constant 0 : i32
    return %c0_i32, %c0_i32_0 : i32, i32
  }
  func.func @transform_9(%arg0: i32) -> (i32, i32) {
    %c0_i32 = arith.constant 0 : i32
    %c0_i32_0 = arith.constant 0 : i32
    %c0_i32_1 = arith.constant 0 : i32
    return %c0_i32, %c0_i32_0 : i32, i32
  }
  func.func @transform_10(%arg0: i32) -> (i32, i32) {
    %c0_i32 = arith.constant 0 : i32
    %c0_i32_0 = arith.constant 0 : i32
    %c0_i32_1 = arith.constant 0 : i32
    return %c0_i32, %c0_i32_0 : i32, i32
  }
}

</mosaic_0001>

<bundles_post_ra>
// kernel: conv_decoder_forward.1
= control target key start
LH: loop header
LB: loop body
LE: loop exit
PB: predicated region body
PF: predicated region fallthrough
CT: control target
= control target key end

     0   :  { %v7984_v1 = vmov 0   ;;  %vm183_vm0 = vcmask 130048   ;;  %v7985_v50 = vmov 0.0   ;;  %vm7987_vm1 = vmmov 0   ;;  %s9617_s2 = inlined_call_operand.vmem [shape: bf16[128,256], index: 2, kind: input, shape index: {}]   ;;  %s9618_s0 = inlined_call_operand.vmem [shape: bf16[8,128], index: 0, kind: input, shape index: {}]   ;;  %s9619_s4 = inlined_call_operand.vmem [shape: f32[16,16], index: 4, kind: input, shape index: {}]   ;;  %s9620_s5 = inlined_call_operand.vmem [shape: bf16[768,128], index: 5, kind: input, shape index: {}]   ;;  %s9621_s1 = inlined_call_operand.vmem [shape: f32[18,128], index: 1, kind: input, shape index: {}]   ;;  %s9622_s3 = inlined_call_operand.vmem [shape: f32[1,128], index: 3, kind: input, shape index: {}]   ;;  %s9623_s7 = inlined_call_operand.vmem [shape: f32[128,4], index: 7, kind: input, shape index: {}]   ;;  %s9624_s8 = inlined_call_operand.vmem [shape: f32[4,128], index: 8, kind: input, shape index: {}]   ;;  %s9625_s6 = inlined_call_operand.vmem [shape: bf16[384,128], index: 6, kind: input, shape index: {}]   ;;  %s9626_s9 = inlined_call_operand.vmem [shape: f32[4,128], index: 9, kind: input, shape index: {}]   ;;  %s9627_s10 = inlined_call_operand.vmem [shape: f32[16,128], index: 10, kind: output, shape index: {}]  }
   0x1   :  { %v7884_v0 = vld [vmem:[%s9617_s2 + $0x4] ss:$8 sps:$4 sm:$0xff]   ;;  %165 = vmatprep.mubr.bf16.mxu0 %v7984_v1  ;;  %v7886_v2 = vld [vmem:[%s9617_s2] ss:$8 sps:$4 sm:$0xff]   ;;  %v7887_v3 = vld [vmem:[%s9617_s2 + $0x14] ss:$8 sps:$4 sm:$0xff]  }
   0x2   :  { %133 = vmatprep.subr.bf16.mxu0 %v7884_v0  ;;  %v7889_v4 = vld [vmem:[%s9617_s2 + $0x10] ss:$8 sps:$4 sm:$0xff]   ;;  %v7890_v5 = vld [vmem:[%s9617_s2 + $0x24] ss:$8 sps:$4 sm:$0xff]   ;;  %v7892_v6 = vld [vmem:[%s9617_s2 + $0x20] ss:$8 sps:$4 sm:$0xff]  }
   0x3   :  { %134 = vmatpush1.bf16.msra.mxu0 %v7886_v2  ;;  %v7893_v7 = vld [vmem:[%s9617_s2 + $0x34] ss:$8 sps:$4 sm:$0xff]   ;;  %v7895_v8 = vld [vmem:[%s9617_s2 + $0x30] ss:$8 sps:$4 sm:$0xff]   ;;  %v7896_v9 = vld [vmem:[%s9617_s2 + $0x44] ss:$8 sps:$4 sm:$0xff]  }
   0x4   :  { %135 = vmatprep.subr.bf16.mxu0 %v7887_v3  ;;  %v7898_v10 = vld [vmem:[%s9617_s2 + $0x40] ss:$8 sps:$4 sm:$0xff]   ;;  %v7899_v11 = vld [vmem:[%s9617_s2 + $0x54] ss:$8 sps:$4 sm:$0xff]   ;;  %v7901_v12 = vld [vmem:[%s9617_s2 + $0x50] ss:$8 sps:$4 sm:$0xff]  }
   0x5   :  { %v7902_v13 = vld [vmem:[%s9617_s2 + $0x64] ss:$8 sps:$4 sm:$0xff]   ;;  %v7904_v14 = vld [vmem:[%s9617_s2 + $0x60] ss:$8 sps:$4 sm:$0xff]   ;;  %v7905_v15 = vld [vmem:[%s9617_s2 + $0x74] ss:$8 sps:$4 sm:$0xff]  }
   0x6   :  { %v7907_v16 = vld [vmem:[%s9617_s2 + $0x70] ss:$8 sps:$4 sm:$0xff]   ;;  %v36_v17 = vld [vmem:[%s9618_s0] sm:$0xf]  ;;  %v7912_v21 = vld [vmem:[%s9620_s5 + $0x48] sm:$0xff]   ;;  %vm1467_vm2 = vcmask 1043456  }
   0x7   :  { %136 = vmatpush1.bf16.msra.mxu0 %v7889_v4  ;;  %v174_v18 = vld [vmem:[%s9619_s4] sm:$0xff]  ;;  %v7913_v22 = vld [vmem:[%s9620_s5 + $0x8] sm:$0xff]   ;;  %v7916_v23 = vld [vmem:[%s9620_s5 + $0x50] sm:$0xff]   ;;  %265 = vst [vmem:[#allocation2] sm:$0x1] %v7985_v50  ;;  %vm1463_vm3 = vcmask 31744  }
   0x8   :  { %137 = vmatprep.subr.bf16.mxu0 %v7890_v5  ;;  %v7908_v19 = vld [vmem:[%s9620_s5 + $0x40] sm:$0xff]   ;;  %v7917_v24 = vld [vmem:[%s9620_s5 + $0x10] sm:$0xff]   ;;  %v7920_v25 = vld [vmem:[%s9620_s5 + $0x58] sm:$0xff]   ;;  %268 = vst [vmem:[#allocation2 + $0x11] sm:$0x1] %v7985_v50 }
   0x9   :  { %v7909_v20 = vld [vmem:[%s9620_s5] sm:$0xff]   ;;  %5678 = vmatprep.subr.bf16.mxu1 %v7908_v19  ;;  %v7921_v26 = vld [vmem:[%s9620_s5 + $0x18] sm:$0xff]   ;;  %v175_v35 = vld [vmem:[%s9619_s4 + $0x8] sm:$0xff]  ;;  %794 = vst [vmem:[#allocation3] sm:$0x1] %v7985_v50 }
   0xa   :  { %5679 = vmatpush3.bf16.msra.mxu1 %v7909_v20  ;;  %v7924_v27 = vld [vmem:[%s9620_s5 + $0x60] sm:$0xff]   ;;  %v7914_v37 = vld [vmem:[%s9620_s5 + $0xc8] sm:$0xff]   ;;  %v7918_v39 = vld [vmem:[%s9620_s5 + $0xd0] sm:$0xff]   ;;  %3045 = vst [vmem:[#allocation3 + $0x11] sm:$0x1] %v7985_v50 }
   0xb   :  { %138 = vmatpush1.bf16.msra.mxu0 %v7892_v6  ;;  %5680 = vmatprep.subr.bf16.mxu1 %v7912_v21  ;;  %v7925_v28 = vld [vmem:[%s9620_s5 + $0x20] sm:$0xff]   ;;  %v7915_v38 = vld [vmem:[%s9620_s5 + $0x88] sm:$0xff]   ;;  %v7919_v40 = vld [vmem:[%s9620_s5 + $0x90] sm:$0xff]  }
   0xc   :  { %139 = vmatprep.subr.bf16.mxu0 %v7893_v7  ;;  %v7910_v33 = vld [vmem:[%s9620_s5 + $0xc0] sm:$0xff]   ;;  %v7922_v41 = vld [vmem:[%s9620_s5 + $0xd8] sm:$0xff]   ;;  %v7928_v45 = vld [vmem:[%s9620_s5 + $0x68] sm:$0xff]  }
   0xd   :  { %v7911_v36 = vld [vmem:[%s9620_s5 + $0x80] sm:$0xff]   ;;  %v7923_v42 = vld [vmem:[%s9620_s5 + $0x98] sm:$0xff]   ;;  %v7929_v46 = vld [vmem:[%s9620_s5 + $0x28] sm:$0xff]  }
   0xe   :  { %5681 = vmatpush3.bf16.msra.mxu1 %v7913_v22  ;;  %v7926_v43 = vld [vmem:[%s9620_s5 + $0xe0] sm:$0xff]   ;;  %v7930_v47 = vld [vmem:[%s9620_s5 + $0xe8] sm:$0xff]   ;;  %v7932_v49 = vld [vmem:[%s9620_s5 + $0x70] sm:$0xff]  }
   0xf   :  { %140 = vmatpush1.bf16.msra.mxu0 %v7895_v8  ;;  %5682 = vmatprep.subr.bf16.mxu1 %v7916_v23  ;;  %v7927_v44 = vld [vmem:[%s9620_s5 + $0xa0] sm:$0xff]   ;;  %v7931_v48 = vld [vmem:[%s9620_s5 + $0xa8] sm:$0xff]   ;;  %v7933_v51 = vld [vmem:[%s9620_s5 + $0x30] sm:$0xff]  }
  0x10   :  { %141 = vmatprep.subr.bf16.mxu0 %v7896_v9  ;;  %v7934_v52 = vld [vmem:[%s9620_s5 + $0xf0] sm:$0xff]   ;;  %v7936_v54 = vld [vmem:[%s9620_s5 + $0x78] sm:$0xff]   ;;  %v275_v58 = vld [vmem:[%s9621_s1] sm:$0xff] }
  0x11   :  { %v7935_v53 = vld [vmem:[%s9620_s5 + $0xb0] sm:$0xff]   ;;  %v7938_v55 = vld [vmem:[%s9620_s5 + $0xf8] sm:$0xff]   ;;  %v276_v59 = vld [vmem:[%s9621_s1 + $0x8] sm:$0xff] }
  0x12   :  { %5683 = vmatpush3.bf16.msra.mxu1 %v7917_v24  ;;  %v7937_v56 = vld [vmem:[%s9620_s5 + $0x38] sm:$0xff]   ;;  %v7940_v60 = vld [vmem:[%s9620_s5 + $0x140] sm:$0xff]   ;;  %v284_v61 = vpack.c.bf16 %v276_v59, %v275_v58  ;;  %v280_v5 = vld [vmem:[%s9621_s1 + $0xa] sm:$0xff] }
  0x13   :  { %142 = vmatpush1.bf16.msra.mxu0 %v7898_v10  ;;  %5684 = vmatprep.subr.bf16.mxu1 %v7920_v25  ;;  %v7939_v57 = vld [vmem:[%s9620_s5 + $0xb8] sm:$0xff]   ;;  %v5597_v62 = vld [vmem:[%s9622_s3] ss:$0 sm:$0xff]  ;;  %v279_v4 = vld [vmem:[%s9621_s1 + $0x2] sm:$0xff] }
  0x14   :  { %143 = vmatprep.subr.bf16.mxu0 %v7899_v11  ;;  %v7941_v7 = vld [vmem:[%s9620_s5 + $0x100] sm:$0xff]   ;;  %v286_v11 = vpack.c.bf16 %v280_v5, %v279_v4  ;;  %v7947_v19 = vld [vmem:[%s9620_s5 + $0x118] sm:$0xff]   ;;  %v7950_v22 = vld [vmem:[%s9620_s5 + $0x168] sm:$0xff]  }
  0x15   :  { %v7948_v20 = vld [vmem:[%s9620_s5 + $0x160] sm:$0xff]   ;;  %v7951_v23 = vld [vmem:[%s9620_s5 + $0x128] sm:$0xff]   ;;  %v7952_v24 = vld [vmem:[%s9620_s5 + $0x170] sm:$0xff]  }
  0x16   :  { %5685 = vmatpush3.bf16.msra.mxu1 %v7921_v26  ;;  %v7949_v21 = vld [vmem:[%s9620_s5 + $0x120] sm:$0xff]   ;;  %v7953_v25 = vld [vmem:[%s9620_s5 + $0x130] sm:$0xff]   ;;  %v7954_v26 = vld [vmem:[%s9620_s5 + $0x178] sm:$0xff]  }
  0x17   :  { %144 = vmatpush1.bf16.msra.mxu0 %v7901_v12  ;;  %5686 = vmatprep.subr.bf16.mxu1 %v7924_v27  ;;  %v7955_v27 = vld [vmem:[%s9620_s5 + $0x138] sm:$0xff]   ;;  %v8336_v58 = vld [vmem:[%s9623_s7 + $0x50] sm:$0xff] }
  0x18   :  { %145 = vmatprep.subr.bf16.mxu0 %v7902_v13  ;;  %v8341_v59 = vld [vmem:[%s9623_s7 + $0x58] sm:$0xff]  ;;  %v8376_v4 = vld [vmem:[%s9623_s7 + $0x70] sm:$0xff] }
  0x19   :  { %v8381_v5 = vld [vmem:[%s9623_s7 + $0x78] sm:$0xff] }
  0x1a   :  { %5687 = vmatpush3.bf16.msra.mxu1 %v7925_v28  ;;  %v277_v28 = vld [vmem:[%s9621_s1 + $0x1] sm:$0xff] }
  0x1b   :  { %146 = vmatpush1.bf16.msra.mxu0 %v7904_v14  ;;  %5688 = vmatprep.subr.bf16.mxu1 %v7928_v45  ;;  %v7942_v14 = vld [vmem:[%s9620_s5 + $0x148] sm:$0xff]  }
  0x1c   :  { %147 = vmatprep.subr.bf16.mxu0 %v7905_v15  ;;  %v7943_v15 = vld [vmem:[%s9620_s5 + $0x108] sm:$0xff]  }
  0x1e   :  { %5689 = vmatpush3.bf16.msra.mxu1 %v7929_v46 }
  0x1f   :  { %148 = vmatpush1.bf16.msra.mxu0 %v7907_v16  ;;  %5690 = vmatprep.subr.bf16.mxu1 %v7932_v49  ;;  %v7944_v16 = vld [vmem:[%s9620_s5 + $0x150] sm:$0xff]  }
  0x22   :  { %166 = vmatmul.mubr.bf16.vlgmr.msra.gmra.mrb[0].mxu0 %v36_v17  ;;  %5691 = vmatpush3.bf16.msra.mxu1 %v7933_v51  ;;  %v7945_v17 = vld [vmem:[%s9620_s5 + $0x110] sm:$0xff]  }
  0x23   :  { %6235 = vmatprep.mubr.msk.f32.mxu0 %vm183_vm0, %v174_v18  ;;  %5692 = vmatprep.subr.bf16.mxu1 %v7936_v54  ;;  %v7946_v18 = vld [vmem:[%s9620_s5 + $0x158] sm:$0xff]   ;;  %v8325_v54 = vld [vmem:[%s9623_s7 + $0x48] sm:$0xff] }
  0x26   :  { %5693 = vmatpush3.bf16.msra.mxu1 %v7937_v56  ;;  %v848_v56 = vand.u32 4294901760, %v8325_v54 }
  0x27   :  { %5722 = vmatprep.subr.bf16.mxu1 %v7940_v60  ;;  %v851_v60 = vand.u32 4294901760, %v8336_v58 }
  0xf5   :  { %v167_v29 = vpop.f32.mrb[0].mxu0 }
  0xf6   :  { %v169_v30 = vpop.f32.mrb[1].mxu0 }
  0xf7   :  { %v7218_v31 = vpack.c.bf16 %v169_v30, %v167_v29  ;;  %v171_v32 = vpop.f32.mrb[2].mxu0  ;;  %v278_v29 = vld [vmem:[%s9621_s1 + $0x9] sm:$0xff] }
  0xf8   :  { %v172_v34 = vpop.f32.mrb[3].mxu0  ;;  %v285_v30 = vpack.c.bf16 %v278_v29, %v277_v28  ;;  %v804_v32 = vld [vmem:[%s9623_s7] sm:$0xff] }
  0xf9   :  { %7219 = vmatprep.subr.bf16.mxu0 %v7218_v31  ;;  %v821_v34 = vand.u32 4294901760, %v804_v32 }
  0xfa   :  { %7221 = vmatpush3.bf16.msra.mxu0 %v7218_v31  ;;  %v7986_v31 = vmov 0.0|0.0  }
  0xfb   :  { %5700 = vmatprep.subr.bf16.mxu0 %v7910_v33  ;;  %v805_v33 = vld [vmem:[%s9623_s7 + $0x8] sm:$0xff] }
  0xfd   :  { %6236 = vmatmul.mubr.msk.f32.vlgmr.msra.gmra.mrb[4].mxu0 %vm183_vm0, %v175_v35  ;;  %v824_v35 = vand.u32 4294901760, %v805_v33 }
  0xfe   :  { %5701 = vmatpush3.bf16.msra.mxu0 %v7911_v36  ;;  %744 = vmatprep.mubr.bf16.mxu0 %v284_v61  ;;  %v854_v61 = vand.u32 4294901760, %v8341_v59 }
  0xff   :  { %5702 = vmatprep.subr.bf16.mxu0 %v7914_v37  ;;  %v8279_v36 = vpack.c.bf16 %v824_v35, %v821_v34  ;;  %v806_v37 = vld [vmem:[%s9623_s7 + $0x10] sm:$0xff] }
 0x102   :  { %5703 = vmatpush3.bf16.msra.mxu0 %v7915_v38  ;;  %v807_v38 = vld [vmem:[%s9623_s7 + $0x18] sm:$0xff] }
 0x103   :  { %5704 = vmatprep.subr.bf16.mxu0 %v7918_v39  ;;  %v827_v39 = vand.u32 4294901760, %v806_v37 }
 0x106   :  { %5705 = vmatpush3.bf16.msra.mxu0 %v7919_v40  ;;  %v830_v40 = vand.u32 4294901760, %v807_v38 }
 0x107   :  { %5706 = vmatprep.subr.bf16.mxu0 %v7922_v41 }
 0x108   :  { %v8289_v41 = vpack.c.bf16 %v830_v40, %v827_v39 }
 0x10a   :  { %5707 = vmatpush3.bf16.msra.mxu0 %v7923_v42  ;;  %v808_v42 = vld [vmem:[%s9623_s7 + $0x20] sm:$0xff] }
 0x10b   :  { %5708 = vmatprep.subr.bf16.mxu0 %v7926_v43  ;;  %v809_v43 = vld [vmem:[%s9623_s7 + $0x28] sm:$0xff] }
 0x10c   :  { %v836_v45 = vand.u32 4294901760, %v809_v43 }
 0x10e   :  { %5709 = vmatpush3.bf16.msra.mxu0 %v7927_v44  ;;  %v833_v44 = vand.u32 4294901760, %v808_v42 }
 0x10f   :  { %5710 = vmatprep.subr.bf16.mxu0 %v7930_v47  ;;  %v8304_v47 = vld [vmem:[%s9623_s7 + $0x30] sm:$0xff] }
 0x110   :  { %v8299_v46 = vpack.c.bf16 %v836_v45, %v833_v44  ;;  %v839_v49 = vand.u32 4294901760, %v8304_v47 }
 0x112   :  { %5711 = vmatpush3.bf16.msra.mxu0 %v7931_v48  ;;  %v8309_v48 = vld [vmem:[%s9623_s7 + $0x38] sm:$0xff] }
 0x113   :  { %5712 = vmatprep.subr.bf16.mxu0 %v7934_v52  ;;  %v842_v51 = vand.u32 4294901760, %v8309_v48 }
 0x115   :  { %v8315_v52 = vpack.c.bf16 %v842_v51, %v839_v49 }
 0x116   :  { %5713 = vmatpush3.bf16.msra.mxu0 %v7935_v53  ;;  %v8320_v53 = vld [vmem:[%s9623_s7 + $0x40] sm:$0xff] }
 0x117   :  { %5714 = vmatprep.subr.bf16.mxu0 %v7938_v55  ;;  %v845_v55 = vand.u32 4294901760, %v8320_v53 }
 0x11a   :  { %5715 = vmatpush3.bf16.msra.mxu0 %v7939_v57  ;;  %v8331_v57 = vpack.c.bf16 %v848_v56, %v845_v55 }
 0x11b   :  { %7222 = vmatprep.subr.bf16.mxu0 %v7986_v31 }
 0x1d0   :  { %v6237_v63 = vpop.f32.mrb[4].mxu0 }
 0x1d1   :  { %v262_v0 = vadd.f32 %v6237_v63, %v5597_v62  ;;  %v256_v1 = vpop.f32.mrb[5].mxu0  ;;  %v8356_v63 = vld [vmem:[%s9623_s7 + $0x60] sm:$0xff] }
 0x1d2   :  { %v257_v2 = vadd.f32 %v5597_v62, %v256_v1  ;;  %v8351_v62 = vpack.c.bf16 %v854_v61, %v851_v60  ;;  %v857_v1 = vand.u32 4294901760, %v8356_v63 }
 0x1d3   :  { %267 = vst [vmem:[#allocation2 + $0x9] sm:$0xff] %v262_v0 }
 0x1d4   :  { %266 = vst [vmem:[#allocation2 + $0x1] sm:$0xff] %v257_v2  ;;  %v282_v3 = vpack.c.bf16 %v262_v0, %v257_v2  ;;  %v8361_v0 = vld [vmem:[%s9623_s7 + $0x68] sm:$0xff] }
 0x1d5   :  { %v860_v2 = vand.u32 4294901760, %v8361_v0 }
 0x1d6   :  { %703 = vmatprep.mubr.bf16.mxu1 %v282_v3 }
 0x1d7   :  { %v8371_v3 = vpack.c.bf16 %v860_v2, %v857_v1 }
 0x1da   :  { %v274_v6 = vld [vmem:[#allocation2 + $0xa] sm:$0xff] }
 0x1db   :  { %v269_v8 = vld [vmem:[#allocation2] sm:$0xff]  ;;  %v270_v9 = vld [vmem:[#allocation2 + $0x8] sm:$0xff] }
 0x1dc   :  { %v273_v10 = vld [vmem:[#allocation2 + $0x2] sm:$0xff]  ;;  %v281_v12 = vpack.c.bf16 %v270_v9, %v269_v8  ;;  %v863_v8 = vand.u32 4294901760, %v8376_v4  ;;  %v866_v9 = vand.u32 4294901760, %v8381_v5 }
 0x1dd   :  { %v283_v13 = vpack.c.bf16 %v274_v6, %v273_v10  ;;  %v8383_v6 = vsub.f32 %v804_v32, %v821_v34  ;;  %v8440_v34 = vsub.f32 %v8304_v47, %v839_v49 }
 0x1de   :  { %704 = vmatmul.mubr.bf16.vlgmr.msra.gmra.mrb[0].mxu1 %v281_v12  ;;  %v8401_v12 = vpack.c.bf16 %v866_v9, %v863_v8 }
 0x1df   :  { %745 = vmatmul.mubr.bf16.vlgmr.msra.gmra.mrb[8].mxu0 %v283_v13  ;;  %5723 = vmatpush3.bf16.msra.mxu1 %v7941_v7  ;;  %v8385_v7 = vsub.f32 %v805_v33, %v824_v35  ;;  %v9643_v10 = vand.u32 4294901760, %v8383_v6  ;;  %v8443_v35 = vsub.f32 %v8309_v48, %v842_v51 }
 0x1e0   :  { %785 = vmatprep.mubr.bf16.mxu1 %v286_v11  ;;  %5724 = vmatprep.subr.bf16.mxu1 %v7942_v14 }
 0x1e1   :  { %7224 = vmatpush3.bf16.msra.mxu0 %v8279_v36  ;;  %6270 = vmatprep.mubr.msk.f32.mxu0 %vm7987_vm1, %v7985_v50  ;;  %v9642_v11 = vand.u32 4294901760, %v8385_v7  ;;  %v915_v13 = vsub.f32 %v8383_v6, %v9643_v10 }
 0x1e2   :  { %7225 = vmatprep.subr.bf16.mxu0 %v7986_v31 }
 0x1e3   :  { %5725 = vmatpush3.bf16.msra.mxu1 %v7943_v15  ;;  %v922_v14 = vsub.f32 %v8385_v7, %v9642_v11  ;;  %v8409_v15 = vsub.f32 %v806_v37, %v827_v39  ;;  %v9637_v39 = vand.u32 4294901760, %v8440_v34 }
 0x1e4   :  { %5726 = vmatprep.subr.bf16.mxu1 %v7944_v16  ;;  %v8411_v16 = vsub.f32 %v807_v38, %v830_v40  ;;  %v9636_v40 = vand.u32 4294901760, %v8443_v35 }
 0x1e5   :  { %7227 = vmatpush3.bf16.msra.mxu0 %v8289_v41 }
 0x1e6   :  { %7228 = vmatprep.subr.bf16.mxu0 %v7986_v31  ;;  %v964_v47 = vsub.f32 %v8443_v35, %v9636_v40 }
 0x1e7   :  { %5727 = vmatpush3.bf16.msra.mxu1 %v7945_v17  ;;  %v916_v17 = vand.u32 4294901760, %v915_v13 }
 0x1e8   :  { %5728 = vmatprep.subr.bf16.mxu1 %v7946_v18  ;;  %v923_v18 = vand.u32 4294901760, %v922_v14  ;;  %v965_v13 = vand.u32 4294901760, %v964_v47 }
 0x1e9   :  { %7230 = vmatpush3.bf16.msra.mxu0 %v8299_v46 }
 0x1ea   :  { %7231 = vmatprep.subr.bf16.mxu0 %v7986_v31 }
 0x1eb   :  { %5729 = vmatpush3.bf16.msra.mxu1 %v7947_v19  ;;  %v9641_v19 = vand.u32 4294901760, %v8409_v15 }
 0x1ec   :  { %5730 = vmatprep.subr.bf16.mxu1 %v7948_v20  ;;  %v9640_v20 = vand.u32 4294901760, %v8411_v16 }
 0x1ed   :  { %7233 = vmatpush3.bf16.msra.mxu0 %v8315_v52 }
 0x1ee   :  { %7234 = vmatprep.subr.bf16.mxu0 %v7986_v31 }
 0x1ef   :  { %5731 = vmatpush3.bf16.msra.mxu1 %v7949_v21  ;;  %v8417_v21 = vpack.c.bf16 %v923_v18, %v916_v17 }
 0x1f0   :  { %5732 = vmatprep.subr.bf16.mxu1 %v7950_v22  ;;  %v929_v22 = vsub.f32 %v8409_v15, %v9641_v19 }
 0x1f1   :  { %7236 = vmatpush3.bf16.msra.mxu0 %v8331_v57 }
 0x1f2   :  { %7237 = vmatprep.subr.bf16.mxu0 %v7986_v31 }
 0x1f3   :  { %5733 = vmatpush3.bf16.msra.mxu1 %v7951_v23  ;;  %v936_v23 = vsub.f32 %v8411_v16, %v9640_v20 }
 0x1f4   :  { %5734 = vmatprep.subr.bf16.mxu1 %v7952_v24  ;;  %v8425_v24 = vsub.f32 %v808_v42, %v833_v44  ;;  %v8453_v44 = vsub.f32 %v8320_v53, %v845_v55  ;;  %v8477_v55 = vsub.f32 %v8341_v59, %v854_v61  ;;  %v8494_v59 = vsub.f32 %v8356_v63, %v857_v1 }
 0x1f5   :  { %7239 = vmatpush3.bf16.msra.mxu0 %v8351_v62  ;;  %v8499_v61 = vsub.f32 %v8361_v0, %v860_v2  ;;  %v8511_v63 = vsub.f32 %v8376_v4, %v863_v8  ;;  %v8516_v0 = vsub.f32 %v8381_v5, %v866_v9 }
 0x1f6   :  { %7240 = vmatprep.subr.bf16.mxu0 %v7986_v31  ;;  %v9639_v28 = vand.u32 4294901760, %v8425_v24  ;;  %v9635_v49 = vand.u32 4294901760, %v8453_v44 }
 0x1f7   :  { %5735 = vmatpush3.bf16.msra.mxu1 %v7953_v25  ;;  %v8427_v25 = vsub.f32 %v809_v43, %v836_v45  ;;  %v957_v43 = vsub.f32 %v8440_v34, %v9637_v39  ;;  %v8456_v45 = vsub.f32 %v8325_v54, %v848_v56  ;;  %v8472_v54 = vsub.f32 %v8336_v58, %v851_v60 }
 0x1f8   :  { %5736 = vmatprep.subr.bf16.mxu1 %v7954_v26  ;;  %v930_v26 = vand.u32 4294901760, %v929_v22  ;;  %v943_v32 = vsub.f32 %v8425_v24, %v9639_v28  ;;  %v971_v14 = vsub.f32 %v8453_v44, %v9635_v49  ;;  %v9629_v47 = vand.u32 4294901760, %v8511_v63 }
 0x1f9   :  { %7242 = vmatpush3.bf16.msra.mxu0 %v8371_v3  ;;  %v9638_v29 = vand.u32 4294901760, %v8427_v25  ;;  %v958_v48 = vand.u32 4294901760, %v957_v43  ;;  %v9634_v51 = vand.u32 4294901760, %v8456_v45  ;;  %v9633_v22 = vand.u32 4294901760, %v8472_v54 }
 0x1fa   :  { %7243 = vmatprep.subr.bf16.mxu0 %v7986_v31  ;;  %v944_v37 = vand.u32 4294901760, %v943_v32  ;;  %v972_v17 = vand.u32 4294901760, %v971_v14  ;;  %v1013_v4 = vsub.f32 %v8511_v63, %v9629_v47 }
 0x1fb   :  { %5737 = vmatpush3.bf16.msra.mxu1 %v7955_v27  ;;  %v937_v27 = vand.u32 4294901760, %v936_v23  ;;  %v950_v33 = vsub.f32 %v8427_v25, %v9638_v29  ;;  %v978_v53 = vsub.f32 %v8456_v45, %v9634_v51  ;;  %v8479_v56 = vpack.c.bf16 %v965_v13, %v958_v48 }
 0x1fc   :  { %6448 = vmatprep.subr.mxu1 %v7985_v50  ;;  %v9632_v23 = vand.u32 4294901760, %v8477_v55  ;;  %v985_v58 = vsub.f32 %v8472_v54, %v9633_v22  ;;  %v9628_v48 = vand.u32 4294901760, %v8516_v0  ;;  %v1014_v9 = vand.u32 4294901760, %v1013_v4 }
 0x1fd   :  { %7245 = vmatpush3.bf16.msra.mxu0 %v8401_v12  ;;  %v951_v38 = vand.u32 4294901760, %v950_v33  ;;  %v979_v18 = vand.u32 4294901760, %v978_v53  ;;  %v9631_v33 = vand.u32 4294901760, %v8494_v59 }
 0x1fe   :  { %786 = vmatmul.mubr.bf16.vlgmr.msra.gmra.mrb[4].mxu1 %v285_v30  ;;  %7246 = vmatprep.subr.bf16.mxu0 %v7986_v31  ;;  %v8431_v30 = vpack.c.bf16 %v937_v27, %v930_v26  ;;  %v992_v60 = vsub.f32 %v8477_v55, %v9632_v23  ;;  %v986_v27 = vand.u32 4294901760, %v985_v58  ;;  %v1020_v8 = vsub.f32 %v8516_v0, %v9628_v48 }
 0x1ff   :  { %6450 = vmatprep.mubr.msk.f32.mxu1 %vm7987_vm1, %v7985_v50  ;;  %v8447_v42 = vpack.c.bf16 %v951_v38, %v944_v37  ;;  %v8483_v26 = vpack.c.bf16 %v979_v18, %v972_v17  ;;  %v9630_v37 = vand.u32 4294901760, %v8499_v61  ;;  %v999_v43 = vsub.f32 %v8494_v59, %v9631_v33 }
 0x200   :  { %v993_v32 = vand.u32 4294901760, %v992_v60  ;;  %v1021_v14 = vand.u32 4294901760, %v1020_v8  ;;  %v8535_v17 = vpack.c.bf16 %v8385_v7, %v8383_v6  ;;  %v8539_v18 = vpack.c.bf16 %v8411_v16, %v8409_v15 }
 0x201   :  { %v1006_v1 = vsub.f32 %v8499_v61, %v9630_v37  ;;  %v1000_v2 = vand.u32 4294901760, %v999_v43  ;;  %v8543_v58 = vpack.c.bf16 %v8427_v25, %v8425_v24  ;;  %v8547_v60 = vpack.c.bf16 %v8443_v35, %v8440_v34 }
 0x202   :  { %v8503_v38 = vpack.c.bf16 %v993_v32, %v986_v27  ;;  %v8531_v53 = vpack.c.bf16 %v1021_v14, %v1014_v9  ;;  %v8551_v27 = vpack.c.bf16 %v8456_v45, %v8453_v44  ;;  %v8555_v32 = vpack.c.bf16 %v8477_v55, %v8472_v54 }
 0x203   :  { %v1007_v13 = vand.u32 4294901760, %v1006_v1  ;;  %v8559_v43 = vpack.c.bf16 %v8499_v61, %v8494_v59  ;;  %v8563_v1 = vpack.c.bf16 %v8516_v0, %v8511_v63 }
 0x205   :  { %v8529_v5 = vpack.c.bf16 %v1007_v13, %v1000_v2 }
 0x2b1   :  { %v5694_v2 = vpop.f32.mrb[0].mxu1 }
 0x2b2   :  { %v5716_v13 = vpop.f32.mrb[8].mxu0  ;;  %v5695_v4 = vpop.f32.mrb[1].mxu1 }
 0x2b3   :  { %v5717_v8 = vpop.f32.mrb[9].mxu0  ;;  %v5696_v9 = vadd.f32 %v5695_v4, %v5694_v2  ;;  %v5697_v48 = vpop.f32.mrb[2].mxu1 }
 0x2b4   :  { %v5718_v14 = vadd.f32 %v5717_v8, %v5716_v13  ;;  %v5719_v47 = vpop.f32.mrb[10].mxu0  ;;  %v5698_v37 = vpop.f32.mrb[3].mxu1 }
 0x2b5   :  { %v5720_v33 = vpop.f32.mrb[11].mxu0  ;;  %v5699_v22 = vadd.f32 %v5698_v37, %v5697_v48 }
 0x2b6   :  { %v747_v23 = vadd.f32 %v5718_v14, %v5696_v9  ;;  %v5721_v51 = vadd.f32 %v5720_v33, %v5719_v47 }
 0x2b8   :  { %v750_v49 = vadd.f32 %v5721_v51, %v5699_v22 }
 0x2d1   :  { %v5738_v40 = vpop.f32.mrb[4].mxu1 }
 0x2d2   :  { %v5739_v39 = vpop.f32.mrb[5].mxu1 }
 0x2d3   :  { %v5740_v29 = vadd.f32 %v5739_v39, %v5738_v40  ;;  %v5741_v28 = vpop.f32.mrb[6].mxu1 }
 0x2d4   :  { %v5742_v20 = vpop.f32.mrb[7].mxu1 }
 0x2d5   :  { %v8565_v19 = vadd.f32 %v5740_v29, %v747_v23  ;;  %v5743_v11 = vadd.f32 %v5742_v20, %v5741_v28  ;;  %v9659_v20 = vand.u32 4294901760, %v8385_v7  ;;  %v9661_v23 = vand.u32 4294901760, %v8411_v16 }
 0x2d6   :  { %v9663_v7 = vand.u32 4294901760, %v8427_v25  ;;  %v9665_v16 = vand.u32 4294901760, %v8443_v35  ;;  %v9667_v25 = vand.u32 4294901760, %v8456_v45  ;;  %v9669_v35 = vand.u32 4294901760, %v8477_v55 }
 0x2d7   :  { %v8567_v10 = vadd.f32 %v5743_v11, %v750_v49  ;;  %v9658_v11 = vand.u32 4294901760, %v8383_v6  ;;  %v9660_v49 = vand.u32 4294901760, %v8409_v15  ;;  %v9662_v6 = vand.u32 4294901760, %v8425_v24 }
 0x2d8   :  { %v9664_v15 = vand.u32 4294901760, %v8440_v34  ;;  %v9666_v24 = vand.u32 4294901760, %v8453_v44  ;;  %v9668_v34 = vand.u32 4294901760, %v8472_v54  ;;  %v9670_v44 = vand.u32 4294901760, %v8494_v59  ;;  %v1462_v59 = vld [vmem:[%s9624_s8] sm:$0xf] }
 0x2d9   :  { %v797_v2 = vadd.f32 %v8567_v10, %v8565_v19  ;;  %v8632_v28 = vpack.c.bf16 %v9659_v20, %v9658_v11  ;;  %v8640_v47 = vpack.c.bf16 %v9661_v23, %v9660_v49  ;;  %v8650_v48 = vpack.c.bf16 %v9663_v7, %v9662_v6 }
 0x2da   :  { %v8658_v14 = vpack.c.bf16 %v9665_v16, %v9664_v15  ;;  %v9671_v45 = vand.u32 4294901760, %v8499_v61  ;;  %v9672_v54 = vand.u32 4294901760, %v8511_v63  ;;  %v9673_v55 = vand.u32 4294901760, %v8516_v0 }
 0x2db   :  { %v798_v13 = vrot.slane %v797_v2, 4  ;;  %v1469_v61 = vsel %vm1467_vm2, %v1462_v59, 0  ;;  %v1917_v6 = vlaneseq }
 0x2dc   :  { %v8721_v63 = vand.u32 4294901760, %v1469_v61 }
 0x2dd   :  { %v799_v4 = vadd.f32 %v798_v13, %v797_v2  ;;  %v8666_v2 = vpack.c.bf16 %v9667_v25, %v9666_v24  ;;  %v8674_v13 = vpack.c.bf16 %v9669_v35, %v9668_v34  ;;  %v1918_v7 = vshrl.u32 %v1917_v6, 7  ;;  %v5648_v6 = vld [vmem:[%s9626_s9 + $0x1] ss:$0 sm:$0xff] }
 0x2de   :  { %6449 = vmatpush3.msra.mxu1 %v8721_v63  ;;  %v8728_v0 = vsub.f32 %v1469_v61, %v8721_v63 }
 0x2df   :  { %v800_v8 = vrot.slane %v799_v4, 2  ;;  %6453 = vmatprep.subr.mxu1 %v7985_v50  ;;  %v8776_v15 = vsub.s32 0, %v1918_v7 }
 0x2e1   :  { %v801_v9 = vadd.f32 %v800_v8, %v799_v4  ;;  %v8682_v4 = vpack.c.bf16 %v9671_v45, %v9670_v44  ;;  %v8690_v8 = vpack.c.bf16 %v9673_v55, %v9672_v54 }
 0x2e3   :  { %v802_v37 = vrot.slane %v801_v9, 1 }
 0x2e5   :  { %v803_v33 = vadd.f32 %v802_v37, %v801_v9 }
 0x2e7   :  { %v8571_v51 = vand.u32 4294901760, %v803_v33 }
 0x2e9   :  { %v902_v39 = vsub.f32 %v803_v33, %v8571_v51 }
 0x2eb   :  { %v903_v40 = vand.u32 4294901760, %v902_v39 }
 0x2ed   :  { %v904_v22 = vsub.f32 %v902_v39, %v903_v40 }
 0x2ef   :  { %v905_v29 = vand.u32 4294901760, %v904_v22 }
 0x2f1   :  { %6271 = vmatmul.mubr.f32.vlgmr.msra.gmra.mrb[6].mxu0 %v905_v29 }
 0x2f2   :  { %7248 = vmatpush3.bf16.msra.mxu0 %v8417_v21  ;;  %6305 = vmatprep.mubr.msk.f32.mxu0 %vm7987_vm1, %v7985_v50 }
 0x2f3   :  { %7249 = vmatprep.subr.bf16.mxu0 %v7986_v31 }
 0x2f6   :  { %7251 = vmatpush3.bf16.msra.mxu0 %v8431_v30 }
 0x2f7   :  { %7252 = vmatprep.subr.bf16.mxu0 %v7986_v31 }
 0x2fa   :  { %7254 = vmatpush3.bf16.msra.mxu0 %v8447_v42 }
 0x2fb   :  { %7255 = vmatprep.subr.bf16.mxu0 %v7986_v31 }
 0x2fe   :  { %7257 = vmatpush3.bf16.msra.mxu0 %v8479_v56 }
 0x2ff   :  { %7258 = vmatprep.subr.bf16.mxu0 %v7986_v31 }
 0x302   :  { %7260 = vmatpush3.bf16.msra.mxu0 %v8483_v26 }
 0x303   :  { %7261 = vmatprep.subr.bf16.mxu0 %v7986_v31 }
 0x306   :  { %7263 = vmatpush3.bf16.msra.mxu0 %v8503_v38 }
 0x307   :  { %7264 = vmatprep.subr.bf16.mxu0 %v7986_v31 }
 0x30a   :  { %7266 = vmatpush3.bf16.msra.mxu0 %v8529_v5 }
 0x30b   :  { %7267 = vmatprep.subr.bf16.mxu0 %v7986_v31 }
 0x30e   :  { %7269 = vmatpush3.bf16.msra.mxu0 %v8531_v53 }
 0x30f   :  { %7270 = vmatprep.subr.bf16.mxu0 %v7986_v31 }
 0x311   :  { %6306 = vmatmul.mubr.f32.vlgmr.msra.gmra.mrb[6].mxu0 %v8571_v51 }
 0x312   :  { %7272 = vmatpush3.bf16.msra.mxu0 %v8535_v17  ;;  %6340 = vmatprep.mubr.msk.f32.mxu0 %vm7987_vm1, %v7985_v50 }
 0x313   :  { %7273 = vmatprep.subr.bf16.mxu0 %v7986_v31 }
 0x316   :  { %7275 = vmatpush3.bf16.msra.mxu0 %v8539_v18 }
 0x317   :  { %7276 = vmatprep.subr.bf16.mxu0 %v7986_v31 }
 0x31a   :  { %7278 = vmatpush3.bf16.msra.mxu0 %v8543_v58 }
 0x31b   :  { %7279 = vmatprep.subr.bf16.mxu0 %v7986_v31 }
 0x31e   :  { %7281 = vmatpush3.bf16.msra.mxu0 %v8547_v60 }
 0x31f   :  { %7282 = vmatprep.subr.bf16.mxu0 %v7986_v31 }
 0x322   :  { %7284 = vmatpush3.bf16.msra.mxu0 %v8551_v27 }
 0x323   :  { %7285 = vmatprep.subr.bf16.mxu0 %v7986_v31 }
 0x326   :  { %7287 = vmatpush3.bf16.msra.mxu0 %v8555_v32 }
 0x327   :  { %7288 = vmatprep.subr.bf16.mxu0 %v7986_v31 }
 0x32a   :  { %7290 = vmatpush3.bf16.msra.mxu0 %v8559_v43 }
 0x32b   :  { %7291 = vmatprep.subr.bf16.mxu0 %v7986_v31 }
 0x32e   :  { %7293 = vmatpush3.bf16.msra.mxu0 %v8563_v1 }
 0x32f   :  { %7294 = vmatprep.subr.bf16.mxu0 %v7986_v31 }
 0x331   :  { %6341 = vmatmul.mubr.f32.vlgmr.msra.gmra.mrb[6].mxu0 %v902_v39  ;;  %v8732_v39 = vand.u32 4294901760, %v8728_v0 }
 0x332   :  { %7296 = vmatpush3.bf16.msra.mxu0 %v8279_v36  ;;  %6375 = vmatprep.mubr.msk.f32.mxu0 %vm7987_vm1, %v7985_v50 }
 0x333   :  { %7297 = vmatprep.subr.bf16.mxu0 %v7986_v31  ;;  %v1551_v29 = vsub.f32 %v8728_v0, %v8732_v39 }
 0x335   :  { %v8736_v49 = vand.u32 4294901760, %v1551_v29 }
 0x336   :  { %7299 = vmatpush3.bf16.msra.mxu0 %v8289_v41 }
 0x337   :  { %7300 = vmatprep.subr.bf16.mxu0 %v7986_v31 }
 0x33a   :  { %7302 = vmatpush3.bf16.msra.mxu0 %v8299_v46 }
 0x33b   :  { %7303 = vmatprep.subr.bf16.mxu0 %v7986_v31 }
 0x33e   :  { %7305 = vmatpush3.bf16.msra.mxu0 %v8315_v52 }
 0x33f   :  { %7306 = vmatprep.subr.bf16.mxu0 %v7986_v31 }
 0x342   :  { %7308 = vmatpush3.bf16.msra.mxu0 %v8331_v57 }
 0x343   :  { %7309 = vmatprep.subr.bf16.mxu0 %v7986_v31 }
 0x346   :  { %7311 = vmatpush3.bf16.msra.mxu0 %v8351_v62 }
 0x347   :  { %7312 = vmatprep.subr.bf16.mxu0 %v7986_v31 }
 0x34a   :  { %7314 = vmatpush3.bf16.msra.mxu0 %v8371_v3 }
 0x34b   :  { %7315 = vmatprep.subr.bf16.mxu0 %v7986_v31 }
 0x34e   :  { %7317 = vmatpush3.bf16.msra.mxu0 %v8401_v12 }
 0x34f   :  { %7318 = vmatprep.subr.bf16.mxu0 %v7986_v31 }
 0x351   :  { %6376 = vmatmul.mubr.f32.vlgmr.msra.gmra.mrb[6].mxu0 %v903_v40 }
 0x352   :  { %7320 = vmatpush3.bf16.msra.mxu0 %v8632_v28  ;;  %6410 = vmatprep.mubr.msk.f32.mxu0 %vm7987_vm1, %v7985_v50 }
 0x353   :  { %7321 = vmatprep.subr.bf16.mxu0 %v7986_v31 }
 0x356   :  { %7323 = vmatpush3.bf16.msra.mxu0 %v8640_v47 }
 0x357   :  { %7324 = vmatprep.subr.bf16.mxu0 %v7986_v31 }
 0x35a   :  { %7326 = vmatpush3.bf16.msra.mxu0 %v8650_v48 }
 0x35b   :  { %7327 = vmatprep.subr.bf16.mxu0 %v7986_v31 }
 0x35e   :  { %7329 = vmatpush3.bf16.msra.mxu0 %v8658_v14 }
 0x35f   :  { %7330 = vmatprep.subr.bf16.mxu0 %v7986_v31 }
 0x362   :  { %7332 = vmatpush3.bf16.msra.mxu0 %v8666_v2 }
 0x363   :  { %7333 = vmatprep.subr.bf16.mxu0 %v7986_v31 }
 0x366   :  { %7335 = vmatpush3.bf16.msra.mxu0 %v8674_v13 }
 0x367   :  { %7336 = vmatprep.subr.bf16.mxu0 %v7986_v31 }
 0x36a   :  { %7338 = vmatpush3.bf16.msra.mxu0 %v8682_v4 }
 0x36b   :  { %7339 = vmatprep.subr.bf16.mxu0 %v7986_v31 }
 0x36e   :  { %7341 = vmatpush3.bf16.msra.mxu0 %v8690_v8 }
 0x36f   :  { %7342 = vmatprep.subr.bf16.mxu0 %v7986_v31 }
 0x371   :  { %6411 = vmatmul.mubr.f32.vlgmr.msra.gmra.mrb[6].mxu0 %v8571_v51 }
 0x372   :  { %7344 = vmatpush3.bf16.msra.mxu0 %v8279_v36  ;;  %6445 = vmatprep.mubr.msk.f32.mxu0 %vm7987_vm1, %v7985_v50 }
 0x373   :  { %7345 = vmatprep.subr.bf16.mxu0 %v7986_v31 }
 0x376   :  { %7347 = vmatpush3.bf16.msra.mxu0 %v8289_v41 }
 0x377   :  { %7348 = vmatprep.subr.bf16.mxu0 %v7986_v31 }
 0x37a   :  { %7350 = vmatpush3.bf16.msra.mxu0 %v8299_v46 }
 0x37b   :  { %7351 = vmatprep.subr.bf16.mxu0 %v7986_v31 }
 0x37e   :  { %7353 = vmatpush3.bf16.msra.mxu0 %v8315_v52 }
 0x37f   :  { %7354 = vmatprep.subr.bf16.mxu0 %v7986_v31 }
 0x382   :  { %7356 = vmatpush3.bf16.msra.mxu0 %v8331_v57 }
 0x383   :  { %7357 = vmatprep.subr.bf16.mxu0 %v7986_v31 }
 0x386   :  { %7359 = vmatpush3.bf16.msra.mxu0 %v8351_v62 }
 0x387   :  { %7360 = vmatprep.subr.bf16.mxu0 %v7986_v31 }
 0x38a   :  { %7362 = vmatpush3.bf16.msra.mxu0 %v8371_v3 }
 0x38b   :  { %7363 = vmatprep.subr.bf16.mxu0 %v7986_v31 }
 0x38e   :  { %7365 = vmatpush3.bf16.msra.mxu0 %v8401_v12 }
 0x38f   :  { %6688 = vmatprep.subr.mxu0 %v7985_v50 }
 0x391   :  { %6446 = vmatmul.mubr.f32.vlgmr.msra.gmra.mrb[6].mxu0 %v8571_v51 }
 0x392   :  { %6690 = vmatprep.mubr.msk.f32.mxu0 %vm7987_vm1, %v7985_v50  ;;  %6689 = vmatpush3.msra.mxu0 %v8721_v63 }
 0x393   :  { %6693 = vmatprep.subr.mxu0 %v7985_v50 }
 0x464   :  { %v1457_v9 = vpop.f32.mrb[6].mxu0 }
 0x465   :  { %v1461_v37 = vmul.f32 0.001953125, %v1457_v9  ;;  %v6447_v33 = vpop.f32.mrb[7].mxu0 }
 0x467   :  { %v1465_v51 = vsel %vm1463_vm3, %v1461_v37, 0 }
 0x468   :  { %v1537_v40 = vand.u32 4294901760, %v1465_v51 }
 0x46a   :  { %v1538_v22 = vsub.f32 %v1465_v51, %v1537_v40 }
 0x46c   :  { %v1539_v11 = vand.u32 4294901760, %v1538_v22 }
 0x46e   :  { %v1540_v20 = vsub.f32 %v1538_v22, %v1539_v11 }
 0x470   :  { %v1541_v23 = vand.u32 4294901760, %v1540_v20 }
 0x472   :  { %6451 = vmatmul.mubr.f32.vlgmr.msra.gmra.mrb[8].mxu1 %v1541_v23 }
 0x473   :  { %6454 = vmatpush3.msra.mxu1 %v8736_v49  ;;  %6455 = vmatprep.mubr.msk.f32.mxu1 %vm7987_vm1, %v7985_v50 }
 0x474   :  { %6458 = vmatprep.subr.mxu1 %v7985_v50 }
 0x47a   :  { %6456 = vmatmul.mubr.f32.vlgmr.msra.gmra.mrb[8].mxu1 %v1537_v40 }
 0x47b   :  { %6459 = vmatpush3.msra.mxu1 %v8728_v0  ;;  %6460 = vmatprep.mubr.msk.f32.mxu1 %vm7987_vm1, %v7985_v50 }
 0x47c   :  { %6463 = vmatprep.subr.mxu1 %v7985_v50 }
 0x482   :  { %6461 = vmatmul.mubr.f32.vlgmr.msra.gmra.mrb[8].mxu1 %v1538_v22 }
 0x483   :  { %6464 = vmatpush3.msra.mxu1 %v8721_v63  ;;  %6465 = vmatprep.mubr.msk.f32.mxu1 %vm7987_vm1, %v7985_v50 }
 0x484   :  { %6468 = vmatprep.subr.mxu1 %v7985_v50 }
 0x48a   :  { %6466 = vmatmul.mubr.f32.vlgmr.msra.gmra.mrb[8].mxu1 %v1539_v11  ;;  %v795_v11 = vld [vmem:[%s9626_s9] sm:$0x1] }
 0x48b   :  { %6469 = vmatpush3.msra.mxu1 %v8732_v39  ;;  %6470 = vmatprep.mubr.msk.f32.mxu1 %vm7987_vm1, %v7985_v50 }
 0x48c   :  { %6473 = vmatprep.subr.mxu1 %v7985_v50 }
 0x492   :  { %6471 = vmatmul.mubr.f32.vlgmr.msra.gmra.mrb[8].mxu1 %v1537_v40 }
 0x493   :  { %6474 = vmatpush3.msra.mxu1 %v8721_v63  ;;  %6475 = vmatprep.mubr.msk.f32.mxu1 %vm7987_vm1, %v7985_v50 }
 0x494   :  { %7366 = vmatprep.subr.bf16.mxu1 %v7986_v31 }
 0x49a   :  { %6476 = vmatmul.mubr.f32.vlgmr.msra.gmra.mrb[8].mxu1 %v1537_v40 }
 0x49b   :  { %7368 = vmatpush3.bf16.msra.mxu1 %v8279_v36  ;;  %6510 = vmatprep.mubr.msk.f32.mxu1 %vm7987_vm1, %v7985_v50 }
 0x49c   :  { %7369 = vmatprep.subr.bf16.mxu1 %v7986_v31 }
 0x49f   :  { %7371 = vmatpush3.bf16.msra.mxu1 %v8289_v41 }
 0x4a0   :  { %7372 = vmatprep.subr.bf16.mxu1 %v7986_v31 }
 0x4a3   :  { %7374 = vmatpush3.bf16.msra.mxu1 %v8299_v46 }
 0x4a4   :  { %7375 = vmatprep.subr.bf16.mxu1 %v7986_v31 }
 0x4a7   :  { %7377 = vmatpush3.bf16.msra.mxu1 %v8315_v52 }
 0x4a8   :  { %7378 = vmatprep.subr.bf16.mxu1 %v7986_v31 }
 0x4ab   :  { %7380 = vmatpush3.bf16.msra.mxu1 %v8331_v57 }
 0x4ac   :  { %7381 = vmatprep.subr.bf16.mxu1 %v7986_v31 }
 0x4af   :  { %7383 = vmatpush3.bf16.msra.mxu1 %v8351_v62 }
 0x4b0   :  { %7384 = vmatprep.subr.bf16.mxu1 %v7986_v31 }
 0x4b3   :  { %7386 = vmatpush3.bf16.msra.mxu1 %v8371_v3 }
 0x4b4   :  { %7387 = vmatprep.subr.bf16.mxu1 %v7986_v31 }
 0x4b7   :  { %7389 = vmatpush3.bf16.msra.mxu1 %v8401_v12 }
 0x4b8   :  { %7390 = vmatprep.subr.bf16.mxu1 %v7986_v31 }
 0x56d   :  { %v1913_v16 = vpop.f32.mrb[8].mxu1 }
 0x56e   :  { %v1920_v24 = vrot.slane %v1913_v16, %v8776_v15  ;;  %v6477_v25 = vpop.f32.mrb[9].mxu1 }
 0x570   :  { %v8780_v34 = vsub.f32 %v8565_v19, %v1920_v24  ;;  %v8783_v35 = vsub.f32 %v8567_v10, %v1920_v24 }
 0x572   :  { %v1923_v44 = vmul.f32 %v8780_v34, %v8780_v34  ;;  %v1924_v45 = vmul.f32 %v8783_v35, %v8783_v35 }
 0x574   :  { %v1925_v54 = vadd.f32 %v1924_v45, %v1923_v44 }
 0x576   :  { %v1926_v55 = vrot.slane %v1925_v54, 4 }
 0x578   :  { %v1927_v59 = vadd.f32 %v1926_v55, %v1925_v54 }
 0x57a   :  { %v1928_v61 = vrot.slane %v1927_v59, 2 }
 0x57c   :  { %v1929_v9 = vadd.f32 %v1928_v61, %v1927_v59 }
 0x57e   :  { %v1930_v37 = vrot.slane %v1929_v9, 1 }
 0x580   :  { %v1931_v33 = vadd.f32 %v1930_v37, %v1929_v9 }
 0x582   :  { %v8789_v51 = vand.u32 4294901760, %v1931_v33 }
 0x584   :  { %v2014_v19 = vsub.f32 %v1931_v33, %v8789_v51 }
 0x586   :  { %v2015_v40 = vand.u32 4294901760, %v2014_v19 }
 0x588   :  { %v2016_v10 = vsub.f32 %v2014_v19, %v2015_v40 }
 0x58a   :  { %v2017_v22 = vand.u32 4294901760, %v2016_v10 }
 0x58c   :  { %6511 = vmatmul.mubr.f32.vlgmr.msra.gmra.mrb[10].mxu1 %v2017_v22 }
 0x58d   :  { %7392 = vmatpush3.bf16.msra.mxu1 %v8417_v21  ;;  %6545 = vmatprep.mubr.msk.f32.mxu1 %vm7987_vm1, %v7985_v50 }
 0x58e   :  { %7393 = vmatprep.subr.bf16.mxu1 %v7986_v31 }
 0x591   :  { %7395 = vmatpush3.bf16.msra.mxu1 %v8431_v30 }
 0x592   :  { %7396 = vmatprep.subr.bf16.mxu1 %v7986_v31 }
 0x595   :  { %7398 = vmatpush3.bf16.msra.mxu1 %v8447_v42  ;;  %v7957_v42 = vld [vmem:[%s9625_s6 + $0x80] sm:$0xff]  }
 0x596   :  { %7399 = vmatprep.subr.bf16.mxu1 %v7986_v31 }
 0x599   :  { %7401 = vmatpush3.bf16.msra.mxu1 %v8479_v56  ;;  %v7958_v56 = vld [vmem:[%s9625_s6] sm:$0xff]  }
 0x59a   :  { %7402 = vmatprep.subr.bf16.mxu1 %v7986_v31 }
 0x59d   :  { %7404 = vmatpush3.bf16.msra.mxu1 %v8483_v26  ;;  %v7959_v26 = vld [vmem:[%s9625_s6 + $0x48] sm:$0xff]  }
 0x59e   :  { %7405 = vmatprep.subr.bf16.mxu1 %v7986_v31 }
 0x5a1   :  { %7407 = vmatpush3.bf16.msra.mxu1 %v8503_v38  ;;  %v7960_v38 = vld [vmem:[%s9625_s6 + $0x88] sm:$0xff]  }
 0x5a2   :  { %7408 = vmatprep.subr.bf16.mxu1 %v7986_v31 }
 0x5a5   :  { %7410 = vmatpush3.bf16.msra.mxu1 %v8529_v5  ;;  %v7961_v5 = vld [vmem:[%s9625_s6 + $0x8] sm:$0xff]  }
 0x5a6   :  { %7411 = vmatprep.subr.bf16.mxu1 %v7986_v31 }
 0x5a9   :  { %7413 = vmatpush3.bf16.msra.mxu1 %v8531_v53  ;;  %v7962_v53 = vld [vmem:[%s9625_s6 + $0x50] sm:$0xff]  }
 0x5aa   :  { %7414 = vmatprep.subr.bf16.mxu1 %v7986_v31 }
 0x5ac   :  { %6546 = vmatmul.mubr.f32.vlgmr.msra.gmra.mrb[10].mxu1 %v8789_v51 }
 0x5ad   :  { %7416 = vmatpush3.bf16.msra.mxu1 %v8535_v17  ;;  %6580 = vmatprep.mubr.msk.f32.mxu1 %vm7987_vm1, %v7985_v50  ;;  %v7963_v17 = vld [vmem:[%s9625_s6 + $0x90] sm:$0xff]  }
 0x5ae   :  { %7417 = vmatprep.subr.bf16.mxu1 %v7986_v31 }
 0x5b1   :  { %7419 = vmatpush3.bf16.msra.mxu1 %v8539_v18  ;;  %v7964_v18 = vld [vmem:[%s9625_s6 + $0x10] sm:$0xff]  }
 0x5b2   :  { %7420 = vmatprep.subr.bf16.mxu1 %v7986_v31 }
 0x5b5   :  { %7422 = vmatpush3.bf16.msra.mxu1 %v8543_v58  ;;  %v7965_v58 = vld [vmem:[%s9625_s6 + $0x58] sm:$0xff]  }
 0x5b6   :  { %7423 = vmatprep.subr.bf16.mxu1 %v7986_v31 }
 0x5b9   :  { %7425 = vmatpush3.bf16.msra.mxu1 %v8547_v60  ;;  %v7966_v60 = vld [vmem:[%s9625_s6 + $0x98] sm:$0xff]  }
 0x5ba   :  { %7426 = vmatprep.subr.bf16.mxu1 %v7986_v31 }
 0x5bd   :  { %7428 = vmatpush3.bf16.msra.mxu1 %v8551_v27  ;;  %v7967_v27 = vld [vmem:[%s9625_s6 + $0x18] sm:$0xff]  }
 0x5be   :  { %7429 = vmatprep.subr.bf16.mxu1 %v7986_v31 }
 0x5c1   :  { %7431 = vmatpush3.bf16.msra.mxu1 %v8555_v32  ;;  %v7968_v32 = vld [vmem:[%s9625_s6 + $0x60] sm:$0xff]  }
 0x5c2   :  { %7432 = vmatprep.subr.bf16.mxu1 %v7986_v31 }
 0x5c5   :  { %7434 = vmatpush3.bf16.msra.mxu1 %v8559_v43  ;;  %v7969_v43 = vld [vmem:[%s9625_s6 + $0xa0] sm:$0xff]  }
 0x5c6   :  { %7435 = vmatprep.subr.bf16.mxu1 %v7986_v31 }
 0x5c9   :  { %7437 = vmatpush3.bf16.msra.mxu1 %v8563_v1  ;;  %v7970_v1 = vld [vmem:[%s9625_s6 + $0x20] sm:$0xff]  }
 0x5ca   :  { %7438 = vmatprep.subr.bf16.mxu1 %v7986_v31 }
 0x5cc   :  { %6581 = vmatmul.mubr.f32.vlgmr.msra.gmra.mrb[10].mxu1 %v2014_v19  ;;  %v3339_v19 = vld [vmem:[%s9623_s7 + $0x8] sm:$0xff] }
 0x5cd   :  { %7440 = vmatpush3.bf16.msra.mxu1 %v8279_v36  ;;  %6615 = vmatprep.mubr.msk.f32.mxu1 %vm7987_vm1, %v7985_v50  ;;  %v3358_v10 = vand.u32 4294901760, %v3339_v19 }
 0x5ce   :  { %7441 = vmatprep.subr.bf16.mxu1 %v7986_v31 }
 0x5d1   :  { %7443 = vmatpush3.bf16.msra.mxu1 %v8289_v41 }
 0x5d2   :  { %7444 = vmatprep.subr.bf16.mxu1 %v7986_v31 }
 0x5d5   :  { %7446 = vmatpush3.bf16.msra.mxu1 %v8299_v46 }
 0x5d6   :  { %7447 = vmatprep.subr.bf16.mxu1 %v7986_v31 }
 0x5d9   :  { %7449 = vmatpush3.bf16.msra.mxu1 %v8315_v52 }
 0x5da   :  { %7450 = vmatprep.subr.bf16.mxu1 %v7986_v31 }
 0x5dd   :  { %7452 = vmatpush3.bf16.msra.mxu1 %v8331_v57 }
 0x5de   :  { %7453 = vmatprep.subr.bf16.mxu1 %v7986_v31 }
 0x5e1   :  { %7455 = vmatpush3.bf16.msra.mxu1 %v8351_v62 }
 0x5e2   :  { %7456 = vmatprep.subr.bf16.mxu1 %v7986_v31 }
 0x5e5   :  { %7458 = vmatpush3.bf16.msra.mxu1 %v8371_v3 }
 0x5e6   :  { %7459 = vmatprep.subr.bf16.mxu1 %v7986_v31 }
 0x5e9   :  { %7461 = vmatpush3.bf16.msra.mxu1 %v8401_v12 }
 0x5ea   :  { %7462 = vmatprep.subr.bf16.mxu1 %v7986_v31 }
 0x5ec   :  { %6616 = vmatmul.mubr.f32.vlgmr.msra.gmra.mrb[10].mxu1 %v2015_v40 }
 0x5ed   :  { %7464 = vmatpush3.bf16.msra.mxu1 %v8632_v28  ;;  %6650 = vmatprep.mubr.msk.f32.mxu1 %vm7987_vm1, %v7985_v50  ;;  %v7971_v28 = vld [vmem:[%s9625_s6 + $0x68] sm:$0xff]  }
 0x5ee   :  { %7465 = vmatprep.subr.bf16.mxu1 %v7986_v31 }
 0x5f1   :  { %7467 = vmatpush3.bf16.msra.mxu1 %v8640_v47  ;;  %v7972_v47 = vld [vmem:[%s9625_s6 + $0xa8] sm:$0xff]  }
 0x5f2   :  { %7468 = vmatprep.subr.bf16.mxu1 %v7986_v31 }
 0x5f5   :  { %7470 = vmatpush3.bf16.msra.mxu1 %v8650_v48  ;;  %v7973_v48 = vld [vmem:[%s9625_s6 + $0x28] sm:$0xff]  }
 0x5f6   :  { %7471 = vmatprep.subr.bf16.mxu1 %v7986_v31 }
 0x5f9   :  { %7473 = vmatpush3.bf16.msra.mxu1 %v8658_v14  ;;  %v7974_v14 = vld [vmem:[%s9625_s6 + $0x70] sm:$0xff]  }
 0x5fa   :  { %7474 = vmatprep.subr.bf16.mxu1 %v7986_v31 }
 0x5fd   :  { %7476 = vmatpush3.bf16.msra.mxu1 %v8666_v2  ;;  %v7975_v2 = vld [vmem:[%s9625_s6 + $0xb0] sm:$0xff]  }
 0x5fe   :  { %7477 = vmatprep.subr.bf16.mxu1 %v7986_v31 }
 0x601   :  { %7479 = vmatpush3.bf16.msra.mxu1 %v8674_v13  ;;  %v7976_v13 = vld [vmem:[%s9625_s6 + $0x30] sm:$0xff]  }
 0x602   :  { %7480 = vmatprep.subr.bf16.mxu1 %v7986_v31 }
 0x605   :  { %7482 = vmatpush3.bf16.msra.mxu1 %v8682_v4  ;;  %v7977_v4 = vld [vmem:[%s9625_s6 + $0x78] sm:$0xff]  }
 0x606   :  { %7483 = vmatprep.subr.bf16.mxu1 %v7986_v31 }
 0x609   :  { %7485 = vmatpush3.bf16.msra.mxu1 %v8690_v8  ;;  %v7978_v8 = vld [vmem:[%s9625_s6 + $0xb8] sm:$0xff]  }
 0x60a   :  { %7486 = vmatprep.subr.bf16.mxu1 %v7986_v31 }
 0x60c   :  { %6651 = vmatmul.mubr.f32.vlgmr.msra.gmra.mrb[10].mxu1 %v8789_v51 }
 0x60d   :  { %7488 = vmatpush3.bf16.msra.mxu1 %v8279_v36  ;;  %6685 = vmatprep.mubr.msk.f32.mxu1 %vm7987_vm1, %v7985_v50 }
 0x60e   :  { %7489 = vmatprep.subr.bf16.mxu1 %v7986_v31 }
 0x611   :  { %7491 = vmatpush3.bf16.msra.mxu1 %v8289_v41 }
 0x612   :  { %7492 = vmatprep.subr.bf16.mxu1 %v7986_v31 }
 0x615   :  { %7494 = vmatpush3.bf16.msra.mxu1 %v8299_v46 }
 0x616   :  { %7495 = vmatprep.subr.bf16.mxu1 %v7986_v31 }
 0x619   :  { %7497 = vmatpush3.bf16.msra.mxu1 %v8315_v52 }
 0x61a   :  { %7498 = vmatprep.subr.bf16.mxu1 %v7986_v31 }
 0x61d   :  { %7500 = vmatpush3.bf16.msra.mxu1 %v8331_v57 }
 0x61e   :  { %7501 = vmatprep.subr.bf16.mxu1 %v7986_v31 }
 0x621   :  { %7503 = vmatpush3.bf16.msra.mxu1 %v8351_v62 }
 0x622   :  { %7504 = vmatprep.subr.bf16.mxu1 %v7986_v31 }
 0x625   :  { %7506 = vmatpush3.bf16.msra.mxu1 %v8371_v3 }
 0x626   :  { %7507 = vmatprep.subr.bf16.mxu1 %v7986_v31 }
 0x629   :  { %7509 = vmatpush3.bf16.msra.mxu1 %v8401_v12  ;;  %v7956_v12 = vld [vmem:[%s9625_s6 + $0x40] sm:$0xff]  }
 0x62a   :  { %6718 = vmatprep.subr.bf16.mxu1 %v7985_v50 }
 0x62c   :  { %6686 = vmatmul.mubr.f32.vlgmr.msra.gmra.mrb[10].mxu1 %v8789_v51 }
 0x62d   :  { %6734 = vmatprep.mubr.msk.bf16.mxu1 %vm7987_vm1, %v7985_v50  ;;  %6719 = vmatpush3.bf16.msra.mxu1 %v7957_v42  ;;  %v3344_v42 = vld [vmem:[%s9623_s7 + $0x30] sm:$0xff] }
 0x62e   :  { %6720 = vmatprep.subr.bf16.mxu1 %v7985_v50 }
 0x631   :  { %6721 = vmatpush3.bf16.msra.mxu1 %v7960_v38 }
 0x632   :  { %6722 = vmatprep.subr.bf16.mxu1 %v7985_v50 }
 0x635   :  { %6723 = vmatpush3.bf16.msra.mxu1 %v7963_v17  ;;  %v3347_v17 = vld [vmem:[%s9623_s7 + $0x48] sm:$0xff] }
 0x636   :  { %6724 = vmatprep.subr.bf16.mxu1 %v7985_v50 }
 0x639   :  { %6725 = vmatpush3.bf16.msra.mxu1 %v7966_v60 }
 0x63a   :  { %6726 = vmatprep.subr.bf16.mxu1 %v7985_v50 }
 0x63d   :  { %6727 = vmatpush3.bf16.msra.mxu1 %v7969_v43 }
 0x63e   :  { %6728 = vmatprep.subr.bf16.mxu1 %v7985_v50 }
 0x641   :  { %6729 = vmatpush3.bf16.msra.mxu1 %v7972_v47  ;;  %v9068_v47 = vld [vmem:[%s9623_s7 + $0x60] sm:$0xff] }
 0x642   :  { %6730 = vmatprep.subr.bf16.mxu1 %v7985_v50 }
 0x645   :  { %6731 = vmatpush3.bf16.msra.mxu1 %v7975_v2 }
 0x646   :  { %6732 = vmatprep.subr.bf16.mxu1 %v7985_v50 }
 0x649   :  { %6733 = vmatpush3.bf16.msra.mxu1 %v7978_v8  ;;  %v9093_v8 = vld [vmem:[%s9623_s7 + $0x78] sm:$0xff] }
 0x64a   :  { %6948 = vmatprep.subr.mxu1 %v7985_v50 }
 0x6ff   :  { %v2569_v36 = vpop.f32.mrb[10].mxu1 }
 0x700   :  { %v2573_v41 = vmul.f32 0.001953125, %v2569_v36  ;;  %v6687_v46 = vpop.f32.mrb[11].mxu1  ;;  %v3340_v36 = vld [vmem:[%s9623_s7 + $0x10] sm:$0xff] }
 0x701   :  { %v3361_v46 = vand.u32 4294901760, %v3340_v36 }
 0x702   :  { %v2575_v52 = vsel %vm1463_vm3, %v2573_v41, 0  ;;  %v3341_v41 = vld [vmem:[%s9623_s7 + $0x18] sm:$0xff] }
 0x703   :  { %v2643_v57 = vand.u32 4294901760, %v2575_v52 }
 0x705   :  { %v2644_v62 = vsub.f32 %v2575_v52, %v2643_v57  ;;  %v3364_v52 = vand.u32 4294901760, %v3341_v41 }
 0x707   :  { %v2645_v21 = vand.u32 4294901760, %v2644_v62 }
 0x709   :  { %v2646_v3 = vsub.f32 %v2644_v62, %v2645_v21 }
 0x70b   :  { %v2647_v30 = vand.u32 4294901760, %v2646_v3 }
 0x70d   :  { %6691 = vmatmul.mubr.f32.vlgmr.msra.gmra.mrb[12].mxu0 %v2647_v30 }
 0x70e   :  { %6694 = vmatpush3.msra.mxu0 %v8736_v49  ;;  %6695 = vmatprep.mubr.msk.f32.mxu0 %vm7987_vm1, %v7985_v50 }
 0x70f   :  { %6698 = vmatprep.subr.mxu0 %v7985_v50 }
 0x715   :  { %6696 = vmatmul.mubr.f32.vlgmr.msra.gmra.mrb[12].mxu0 %v2643_v57 }
 0x716   :  { %6699 = vmatpush3.msra.mxu0 %v8728_v0  ;;  %6700 = vmatprep.mubr.msk.f32.mxu0 %vm7987_vm1, %v7985_v50 }
 0x717   :  { %6703 = vmatprep.subr.mxu0 %v7985_v50 }
 0x71d   :  { %6701 = vmatmul.mubr.f32.vlgmr.msra.gmra.mrb[12].mxu0 %v2644_v62  ;;  %v3342_v62 = vld [vmem:[%s9623_s7 + $0x20] sm:$0xff] }
 0x71e   :  { %6704 = vmatpush3.msra.mxu0 %v8721_v63  ;;  %6705 = vmatprep.mubr.msk.f32.mxu0 %vm7987_vm1, %v7985_v50  ;;  %v3367_v3 = vand.u32 4294901760, %v3342_v62 }
 0x71f   :  { %6708 = vmatprep.subr.mxu0 %v7985_v50 }
 0x725   :  { %6706 = vmatmul.mubr.f32.vlgmr.msra.gmra.mrb[12].mxu0 %v2645_v21  ;;  %v3343_v21 = vld [vmem:[%s9623_s7 + $0x28] sm:$0xff] }
 0x726   :  { %6709 = vmatpush3.msra.mxu0 %v8732_v39  ;;  %6710 = vmatprep.mubr.msk.f32.mxu0 %vm7987_vm1, %v7985_v50  ;;  %v3370_v30 = vand.u32 4294901760, %v3343_v21 }
 0x727   :  { %6713 = vmatprep.subr.mxu0 %v7985_v50 }
 0x72d   :  { %6711 = vmatmul.mubr.f32.vlgmr.msra.gmra.mrb[12].mxu0 %v2643_v57 }
 0x72e   :  { %6714 = vmatpush3.msra.mxu0 %v8721_v63  ;;  %6715 = vmatprep.mubr.msk.f32.mxu0 %vm7987_vm1, %v7985_v50  ;;  %v7979_v63 = vld [vmem:[%s9625_s6 + $0x38] sm:$0xff]  }
 0x72f   :  { %5972 = vmatprep.subr.bf16.mxu0 %v7956_v12  ;;  %v9027_v12 = vpack.c.bf16 %v3370_v30, %v3367_v3 }
 0x735   :  { %6716 = vmatmul.mubr.f32.vlgmr.msra.gmra.mrb[12].mxu0 %v2643_v57  ;;  %v9017_v57 = vpack.c.bf16 %v3364_v52, %v3361_v46 }
 0x736   :  { %5973 = vmatpush3.bf16.msra.mxu0 %v7958_v56  ;;  %v3345_v56 = vld [vmem:[%s9623_s7 + $0x38] sm:$0xff] }
 0x737   :  { %5974 = vmatprep.subr.bf16.mxu0 %v7959_v26  ;;  %v3373_v26 = vand.u32 4294901760, %v3344_v42  ;;  %v3376_v38 = vand.u32 4294901760, %v3345_v56 }
 0x73a   :  { %5975 = vmatpush3.bf16.msra.mxu0 %v7961_v5  ;;  %v9037_v5 = vpack.c.bf16 %v3376_v38, %v3373_v26 }
 0x73b   :  { %5976 = vmatprep.subr.bf16.mxu0 %v7962_v53  ;;  %v3346_v53 = vld [vmem:[%s9623_s7 + $0x40] sm:$0xff] }
 0x73e   :  { %5977 = vmatpush3.bf16.msra.mxu0 %v7964_v18  ;;  %v3379_v18 = vand.u32 4294901760, %v3346_v53 }
 0x73f   :  { %5978 = vmatprep.subr.bf16.mxu0 %v7965_v58  ;;  %v3382_v58 = vand.u32 4294901760, %v3347_v17 }
 0x741   :  { %v9047_v60 = vpack.c.bf16 %v3382_v58, %v3379_v18 }
 0x742   :  { %5979 = vmatpush3.bf16.msra.mxu0 %v7967_v27  ;;  %v9052_v27 = vld [vmem:[%s9623_s7 + $0x50] sm:$0xff] }
 0x743   :  { %5980 = vmatprep.subr.bf16.mxu0 %v7968_v32  ;;  %v9057_v32 = vld [vmem:[%s9623_s7 + $0x58] sm:$0xff]  ;;  %v3385_v43 = vand.u32 4294901760, %v9052_v27 }
 0x746   :  { %5981 = vmatpush3.bf16.msra.mxu0 %v7970_v1  ;;  %v3388_v1 = vand.u32 4294901760, %v9057_v32 }
 0x747   :  { %5982 = vmatprep.subr.bf16.mxu0 %v7971_v28 }
 0x748   :  { %v9063_v28 = vpack.c.bf16 %v3388_v1, %v3385_v43 }
 0x74a   :  { %5983 = vmatpush3.bf16.msra.mxu0 %v7973_v48  ;;  %v9073_v48 = vld [vmem:[%s9623_s7 + $0x68] sm:$0xff] }
 0x74b   :  { %5984 = vmatprep.subr.bf16.mxu0 %v7974_v14  ;;  %v3391_v14 = vand.u32 4294901760, %v9068_v47  ;;  %v3394_v2 = vand.u32 4294901760, %v9073_v48 }
 0x74e   :  { %5985 = vmatpush3.bf16.msra.mxu0 %v7976_v13  ;;  %v9083_v13 = vpack.c.bf16 %v3394_v2, %v3391_v14 }
 0x74f   :  { %5986 = vmatprep.subr.bf16.mxu0 %v7977_v4  ;;  %v9088_v4 = vld [vmem:[%s9623_s7 + $0x70] sm:$0xff] }
 0x752   :  { %5987 = vmatpush3.bf16.msra.mxu0 %v7979_v63 }
 0x753   :  { %7510 = vmatprep.subr.bf16.mxu0 %v7986_v31 }
 0x808   :  { %v3019_v0 = vpop.f32.mrb[12].mxu0 }
 0x809   :  { %v7798_v39 = vadd.f32 1e-05, %v3019_v0  ;;  %v6717_v29 = vpop.f32.mrb[13].mxu0  ;;  %v9097_v0 = vsub.f32 %v3339_v19, %v3358_v10 }
 0x80a   :  { %v3400_v29 = vand.u32 4294901760, %v9093_v8 }
 0x80b   :  { %7980 = vrsqrt.f32 %v7798_v39  ;;  %v3397_v39 = vand.u32 4294901760, %v9088_v4 }
 0x815   :  { %v7981_v20 = vpop.eup %7980 }
 0x816   :  { %v3024_v49 = vmul.f32 %v7981_v20, %v795_v11  ;;  %v3455_v20 = vand.u32 4294901760, %v9097_v0 }
 0x818   :  { %v3028_v23 = vrot.slane %v3024_v49, %v8776_v15  ;;  %v9109_v49 = vpack.c.bf16 %v3400_v29, %v3397_v39 }
 0x81a   :  { %v3029_v7 = vmul.f32 %v3028_v23, %v8780_v34  ;;  %v3030_v16 = vmul.f32 %v3028_v23, %v8783_v35  ;;  %v3338_v35 = vld [vmem:[%s9623_s7] sm:$0xff] }
 0x81b   :  { %v3355_v40 = vand.u32 4294901760, %v3338_v35 }
 0x81c   :  { %v3035_v24 = vadd.f32 %v5648_v6, %v3029_v7  ;;  %v3036_v25 = vadd.f32 %v5648_v6, %v3030_v16  ;;  %v3456_v6 = vsub.f32 %v9097_v0, %v3455_v20  ;;  %v9117_v7 = vsub.f32 %v3340_v36, %v3361_v46 }
 0x81d   :  { %v9007_v22 = vpack.c.bf16 %v3358_v10, %v3355_v40  ;;  %v9095_v63 = vsub.f32 %v3338_v35, %v3355_v40  ;;  %v9119_v16 = vsub.f32 %v3341_v41, %v3364_v52  ;;  %v9147_v10 = vsub.f32 %v3344_v42, %v3373_v26 }
 0x81e   :  { %vm3037_vm4 = vcmp.gt.f32.partialorder %v3035_v24, 0.0  ;;  %vm3038_vm5 = vcmp.gt.f32.partialorder %v3036_v25, 0.0  ;;  %v3039_v44 = vmul.f32 0.01, %v3035_v24  ;;  %v3040_v45 = vmul.f32 0.01, %v3036_v25 }
 0x81f   :  { %v3448_v11 = vand.u32 4294901760, %v9095_v63  ;;  %v9149_v36 = vsub.f32 %v3345_v56, %v3376_v38  ;;  %v9653_v52 = vand.u32 4294901760, %v9147_v10 }
 0x820   :  { %v3041_v54 = vsel %vm3037_vm4, %v3035_v24, %v3039_v44  ;;  %v3042_v55 = vsel %vm3038_vm5, %v3036_v25, %v3040_v45  ;;  %v3457_v25 = vand.u32 4294901760, %v3456_v6  ;;  %v9657_v44 = vand.u32 4294901760, %v9117_v7 }
 0x821   :  { %3043 = vst [vmem:[#allocation3 + $0x1] sm:$0xff] %v3041_v54  ;;  %3044 = vst [vmem:[#allocation3 + $0x9] sm:$0xff] %v3042_v55  ;;  %v3053_v59 = vpack.c.bf16 %v3042_v55, %v3041_v54  ;;  %v3449_v23 = vsub.f32 %v9095_v63, %v3448_v11  ;;  %v9656_v45 = vand.u32 4294901760, %v9119_v16 }
 0x822   :  { %v3463_v55 = vsub.f32 %v9117_v7, %v9657_v44 }
 0x823   :  { %3279 = vmatprep.mubr.bf16.mxu0 %v3053_v59  ;;  %v3450_v24 = vand.u32 4294901760, %v3449_v23  ;;  %v3470_v59 = vsub.f32 %v9119_v16, %v9656_v45  ;;  %v9160_v23 = vsub.f32 %v3347_v17, %v3382_v58  ;;  %v9174_v17 = vsub.f32 %v9052_v27, %v3385_v43 }
 0x824   :  { %v9199_v43 = vsub.f32 %v9073_v48, %v3394_v2  ;;  %v9216_v48 = vsub.f32 %v9093_v8, %v3400_v29 }
 0x825   :  { %v9125_v54 = vpack.c.bf16 %v3457_v25, %v3450_v24  ;;  %v9650_v38 = vand.u32 4294901760, %v9160_v23 }
 0x828   :  { %v3050_v61 = vld [vmem:[#allocation3 + $0x2] sm:$0xff]  ;;  %v3051_v9 = vld [vmem:[#allocation3 + $0xa] sm:$0xff] }
 0x829   :  { %v3046_v37 = vld [vmem:[#allocation3] sm:$0xff]  ;;  %v3054_v33 = vpack.c.bf16 %v3051_v9, %v3050_v61  ;;  %v3047_v51 = vld [vmem:[#allocation3 + $0x8] sm:$0xff]  ;;  %v9133_v61 = vsub.f32 %v3342_v62, %v3367_v3  ;;  %v9135_v9 = vsub.f32 %v3343_v21, %v3370_v30  ;;  %v9652_v62 = vand.u32 4294901760, %v9149_v36 }
 0x82a   :  { %v3052_v34 = vpack.c.bf16 %v3047_v51, %v3046_v37  ;;  %v3464_v37 = vand.u32 4294901760, %v3463_v55  ;;  %v3491_v3 = vsub.f32 %v9147_v10, %v9653_v52  ;;  %v9158_v30 = vsub.f32 %v3346_v53, %v3379_v18 }
 0x82b   :  { %6735 = vmatmul.mubr.bf16.vlgmr.msra.gmra.mrb[12].mxu1 %v3054_v33  ;;  %v3471_v33 = vand.u32 4294901760, %v3470_v59  ;;  %v9655_v51 = vand.u32 4294901760, %v9133_v61  ;;  %v3498_v42 = vsub.f32 %v9149_v36, %v9652_v62  ;;  %v3512_v53 = vsub.f32 %v9160_v23, %v9650_v38 }
 0x82c   :  { %3280 = vmatmul.mubr.bf16.vlgmr.msra.gmra.mrb[16].mxu0 %v3052_v34  ;;  %6950 = vmatprep.mubr.msk.f32.mxu1 %vm7987_vm1, %v7985_v50  ;;  %v9654_v34 = vand.u32 4294901760, %v9135_v9  ;;  %v3492_v56 = vand.u32 4294901760, %v3491_v3  ;;  %v9651_v26 = vand.u32 4294901760, %v9158_v30  ;;  %v9177_v18 = vsub.f32 %v9057_v32, %v3388_v1 }
 0x82d   :  { %6770 = vmatprep.mubr.msk.f32.mxu0 %vm7987_vm1, %v7985_v50  ;;  %7512 = vmatpush3.bf16.msra.mxu0 %v9007_v22  ;;  %v9139_v35 = vpack.c.bf16 %v3471_v33, %v3464_v37  ;;  %v3477_v19 = vsub.f32 %v9133_v61, %v9655_v51  ;;  %v3499_v6 = vand.u32 4294901760, %v3498_v42  ;;  %v3513_v55 = vand.u32 4294901760, %v3512_v53 }
 0x82e   :  { %7513 = vmatprep.subr.bf16.mxu0 %v7986_v31  ;;  %v3484_v40 = vsub.f32 %v9135_v9, %v9654_v34  ;;  %v3505_v24 = vsub.f32 %v9158_v30, %v9651_v26  ;;  %v9649_v59 = vand.u32 4294901760, %v9174_v17  ;;  %v9648_v37 = vand.u32 4294901760, %v9177_v18 }
 0x82f   :  { %v3478_v41 = vand.u32 4294901760, %v3477_v19  ;;  %v9179_v58 = vpack.c.bf16 %v3499_v6, %v3492_v56  ;;  %v9194_v32 = vsub.f32 %v9068_v47, %v3391_v14  ;;  %v9211_v47 = vsub.f32 %v9088_v4, %v3397_v39 }
 0x830   :  { %v3485_v46 = vand.u32 4294901760, %v3484_v40  ;;  %v3506_v25 = vand.u32 4294901760, %v3505_v24  ;;  %v3519_v19 = vsub.f32 %v9174_v17, %v9649_v59  ;;  %v3526_v27 = vsub.f32 %v9177_v18, %v9648_v37 }
 0x831   :  { %7515 = vmatpush3.bf16.msra.mxu0 %v9017_v57  ;;  %v9645_v56 = vand.u32 4294901760, %v9211_v47  ;;  %v9644_v6 = vand.u32 4294901760, %v9216_v48 }
 0x832   :  { %7516 = vmatprep.subr.bf16.mxu0 %v7986_v31  ;;  %v9153_v21 = vpack.c.bf16 %v3485_v46, %v3478_v41  ;;  %v9183_v33 = vpack.c.bf16 %v3513_v55, %v3506_v25  ;;  %v3520_v1 = vand.u32 4294901760, %v3519_v19  ;;  %v3527_v40 = vand.u32 4294901760, %v3526_v27 }
 0x833   :  { %v9647_v41 = vand.u32 4294901760, %v9194_v32  ;;  %v9646_v46 = vand.u32 4294901760, %v9199_v43  ;;  %v3547_v4 = vsub.f32 %v9211_v47, %v9645_v56  ;;  %v3554_v39 = vsub.f32 %v9216_v48, %v9644_v6 }
 0x834   :  { %v9203_v3 = vpack.c.bf16 %v3527_v40, %v3520_v1  ;;  %v9235_v55 = vpack.c.bf16 %v9097_v0, %v9095_v63  ;;  %v9239_v19 = vpack.c.bf16 %v9119_v16, %v9117_v7  ;;  %v9243_v27 = vpack.c.bf16 %v9135_v9, %v9133_v61 }
 0x835   :  { %7518 = vmatpush3.bf16.msra.mxu0 %v9027_v12  ;;  %v3533_v42 = vsub.f32 %v9194_v32, %v9647_v41  ;;  %v3540_v14 = vsub.f32 %v9199_v43, %v9646_v46  ;;  %v3548_v29 = vand.u32 4294901760, %v3547_v4  ;;  %v3555_v53 = vand.u32 4294901760, %v3554_v39 }
 0x836   :  { %7519 = vmatprep.subr.bf16.mxu0 %v7986_v31  ;;  %v9247_v1 = vpack.c.bf16 %v9149_v36, %v9147_v10  ;;  %v9251_v40 = vpack.c.bf16 %v9160_v23, %v9158_v30  ;;  %v9676_v63 = vand.u32 4294901760, %v9133_v61  ;;  %v9677_v0 = vand.u32 4294901760, %v9135_v9 }
 0x837   :  { %v3534_v2 = vand.u32 4294901760, %v3533_v42  ;;  %v3541_v24 = vand.u32 4294901760, %v3540_v14  ;;  %v9231_v25 = vpack.c.bf16 %v3555_v53, %v3548_v29  ;;  %v9255_v42 = vpack.c.bf16 %v9177_v18, %v9174_v17 }
 0x838   :  { %v9259_v14 = vpack.c.bf16 %v9199_v43, %v9194_v32  ;;  %v9680_v61 = vand.u32 4294901760, %v9158_v30  ;;  %v9681_v9 = vand.u32 4294901760, %v9160_v23  ;;  %v9684_v30 = vand.u32 4294901760, %v9194_v32  ;;  %v3996_v32 = vld [vmem:[%s9624_s8] sm:$0xf] }
 0x839   :  { %7521 = vmatpush3.bf16.msra.mxu0 %v9037_v5  ;;  %v9229_v8 = vpack.c.bf16 %v3541_v24, %v3534_v2  ;;  %v9263_v2 = vpack.c.bf16 %v9216_v48, %v9211_v47  ;;  %v9685_v23 = vand.u32 4294901760, %v9199_v43  ;;  %v4001_v43 = vsel %vm1467_vm2, %v3996_v32, 0 }
 0x83a   :  { %7522 = vmatprep.subr.bf16.mxu0 %v7986_v31 }
 0x83d   :  { %7524 = vmatpush3.bf16.msra.mxu0 %v9047_v60 }
 0x83e   :  { %7525 = vmatprep.subr.bf16.mxu0 %v7986_v31 }
 0x841   :  { %7527 = vmatpush3.bf16.msra.mxu0 %v9063_v28 }
 0x842   :  { %7528 = vmatprep.subr.bf16.mxu0 %v7986_v31 }
 0x845   :  { %7530 = vmatpush3.bf16.msra.mxu0 %v9083_v13 }
 0x846   :  { %7531 = vmatprep.subr.bf16.mxu0 %v7986_v31 }
 0x849   :  { %7533 = vmatpush3.bf16.msra.mxu0 %v9109_v49 }
 0x84a   :  { %7534 = vmatprep.subr.bf16.mxu0 %v7986_v31 }
 0x8fe   :  { %v3322_v24 = vpop.f32.mrb[12].mxu1 }
 0x8ff   :  { %v5988_v4 = vpop.f32.mrb[16].mxu0  ;;  %v6736_v39 = vpop.f32.mrb[13].mxu1 }
 0x900   :  { %v5989_v29 = vpop.f32.mrb[17].mxu0  ;;  %v3325_v53 = vpop.f32.mrb[14].mxu1 }
 0x901   :  { %v5990_v6 = vadd.f32 %v5989_v29, %v5988_v4  ;;  %v5991_v56 = vpop.f32.mrb[18].mxu0  ;;  %v6737_v46 = vpop.f32.mrb[15].mxu1 }
 0x902   :  { %v5992_v41 = vpop.f32.mrb[19].mxu0 }
 0x903   :  { %v9265_v37 = vadd.f32 %v5990_v6, %v3322_v24  ;;  %v5993_v59 = vadd.f32 %v5992_v41, %v5991_v56 }
 0x905   :  { %v9267_v38 = vadd.f32 %v5993_v59, %v3325_v53  ;;  %v9382_v59 = vpack.c.bf16 %v9685_v23, %v9684_v30 }
 0x907   :  { %v3331_v26 = vadd.f32 %v9267_v38, %v9265_v37 }
 0x909   :  { %v3332_v62 = vrot.slane %v3331_v26, 4 }
 0x90b   :  { %v3333_v52 = vadd.f32 %v3332_v62, %v3331_v26  ;;  %v9366_v62 = vpack.c.bf16 %v9681_v9, %v9680_v61 }
 0x90d   :  { %v3334_v34 = vrot.slane %v3333_v52, 2 }
 0x90f   :  { %v3335_v51 = vadd.f32 %v3334_v34, %v3333_v52  ;;  %v9675_v34 = vand.u32 4294901760, %v9119_v16 }
 0x911   :  { %v3336_v45 = vrot.slane %v3335_v51, 1 }
 0x913   :  { %v3337_v39 = vadd.f32 %v3336_v45, %v3335_v51  ;;  %v9332_v45 = vpack.c.bf16 %v3455_v20, %v3448_v11  ;;  %v9674_v51 = vand.u32 4294901760, %v9117_v7  ;;  %v9350_v11 = vpack.c.bf16 %v9677_v0, %v9676_v63 }
 0x914   :  { %v9678_v20 = vand.u32 4294901760, %v9147_v10  ;;  %v9679_v7 = vand.u32 4294901760, %v9149_v36  ;;  %v9682_v10 = vand.u32 4294901760, %v9174_v17  ;;  %v9683_v36 = vand.u32 4294901760, %v9177_v18 }
 0x915   :  { %v9271_v44 = vand.u32 4294901760, %v3337_v39  ;;  %v9340_v52 = vpack.c.bf16 %v9675_v34, %v9674_v51  ;;  %v9686_v17 = vand.u32 4294901760, %v9211_v47  ;;  %v9687_v18 = vand.u32 4294901760, %v9216_v48 }
 0x916   :  { %v9358_v16 = vpack.c.bf16 %v9679_v7, %v9678_v20  ;;  %v9374_v26 = vpack.c.bf16 %v9683_v36, %v9682_v10  ;;  %v9421_v47 = vand.u32 4294901760, %v4001_v43 }
 0x917   :  { %v3436_v4 = vsub.f32 %v3337_v39, %v9271_v44  ;;  %v9390_v41 = vpack.c.bf16 %v9687_v18, %v9686_v17 }
 0x918   :  { %6949 = vmatpush3.msra.mxu1 %v9421_v47 }
 0x919   :  { %v3437_v46 = vand.u32 4294901760, %v3436_v4  ;;  %6953 = vmatprep.subr.mxu1 %v7985_v50 }
 0x91b   :  { %v3438_v29 = vsub.f32 %v3436_v4, %v3437_v46 }
 0x91d   :  { %v3439_v6 = vand.u32 4294901760, %v3438_v29 }
 0x91f   :  { %6771 = vmatmul.mubr.f32.vlgmr.msra.gmra.mrb[14].mxu0 %v3439_v6 }
 0x920   :  { %7536 = vmatpush3.bf16.msra.mxu0 %v9125_v54  ;;  %6805 = vmatprep.mubr.msk.f32.mxu0 %vm7987_vm1, %v7985_v50 }
 0x921   :  { %7537 = vmatprep.subr.bf16.mxu0 %v7986_v31 }
 0x924   :  { %7539 = vmatpush3.bf16.msra.mxu0 %v9139_v35 }
 0x925   :  { %7540 = vmatprep.subr.bf16.mxu0 %v7986_v31 }
 0x928   :  { %7542 = vmatpush3.bf16.msra.mxu0 %v9153_v21 }
 0x929   :  { %7543 = vmatprep.subr.bf16.mxu0 %v7986_v31 }
 0x92c   :  { %7545 = vmatpush3.bf16.msra.mxu0 %v9179_v58 }
 0x92d   :  { %7546 = vmatprep.subr.bf16.mxu0 %v7986_v31 }
 0x930   :  { %7548 = vmatpush3.bf16.msra.mxu0 %v9183_v33 }
 0x931   :  { %7549 = vmatprep.subr.bf16.mxu0 %v7986_v31 }
 0x934   :  { %7551 = vmatpush3.bf16.msra.mxu0 %v9203_v3 }
 0x935   :  { %7552 = vmatprep.subr.bf16.mxu0 %v7986_v31 }
 0x938   :  { %7554 = vmatpush3.bf16.msra.mxu0 %v9229_v8 }
 0x939   :  { %7555 = vmatprep.subr.bf16.mxu0 %v7986_v31 }
 0x93c   :  { %7557 = vmatpush3.bf16.msra.mxu0 %v9231_v25 }
 0x93d   :  { %7558 = vmatprep.subr.bf16.mxu0 %v7986_v31 }
 0x93f   :  { %6806 = vmatmul.mubr.f32.vlgmr.msra.gmra.mrb[14].mxu0 %v9271_v44 }
 0x940   :  { %7560 = vmatpush3.bf16.msra.mxu0 %v9235_v55  ;;  %6840 = vmatprep.mubr.msk.f32.mxu0 %vm7987_vm1, %v7985_v50 }
 0x941   :  { %7561 = vmatprep.subr.bf16.mxu0 %v7986_v31 }
 0x944   :  { %7563 = vmatpush3.bf16.msra.mxu0 %v9239_v19 }
 0x945   :  { %7564 = vmatprep.subr.bf16.mxu0 %v7986_v31 }
 0x948   :  { %7566 = vmatpush3.bf16.msra.mxu0 %v9243_v27 }
 0x949   :  { %7567 = vmatprep.subr.bf16.mxu0 %v7986_v31 }
 0x94c   :  { %7569 = vmatpush3.bf16.msra.mxu0 %v9247_v1 }
 0x94d   :  { %7570 = vmatprep.subr.bf16.mxu0 %v7986_v31 }
 0x950   :  { %7572 = vmatpush3.bf16.msra.mxu0 %v9251_v40 }
 0x951   :  { %7573 = vmatprep.subr.bf16.mxu0 %v7986_v31 }
 0x954   :  { %7575 = vmatpush3.bf16.msra.mxu0 %v9255_v42 }
 0x955   :  { %7576 = vmatprep.subr.bf16.mxu0 %v7986_v31 }
 0x958   :  { %7578 = vmatpush3.bf16.msra.mxu0 %v9259_v14 }
 0x959   :  { %7579 = vmatprep.subr.bf16.mxu0 %v7986_v31 }
 0x95c   :  { %7581 = vmatpush3.bf16.msra.mxu0 %v9263_v2 }
 0x95d   :  { %7582 = vmatprep.subr.bf16.mxu0 %v7986_v31 }
 0x95f   :  { %6841 = vmatmul.mubr.f32.vlgmr.msra.gmra.mrb[14].mxu0 %v3436_v4 }
 0x960   :  { %7584 = vmatpush3.bf16.msra.mxu0 %v9007_v22  ;;  %6875 = vmatprep.mubr.msk.f32.mxu0 %vm7987_vm1, %v7985_v50 }
 0x961   :  { %7585 = vmatprep.subr.bf16.mxu0 %v7986_v31 }
 0x964   :  { %7587 = vmatpush3.bf16.msra.mxu0 %v9017_v57 }
 0x965   :  { %7588 = vmatprep.subr.bf16.mxu0 %v7986_v31 }
 0x968   :  { %7590 = vmatpush3.bf16.msra.mxu0 %v9027_v12 }
 0x969   :  { %7591 = vmatprep.subr.bf16.mxu0 %v7986_v31 }
 0x96c   :  { %7593 = vmatpush3.bf16.msra.mxu0 %v9037_v5 }
 0x96d   :  { %7594 = vmatprep.subr.bf16.mxu0 %v7986_v31 }
 0x970   :  { %7596 = vmatpush3.bf16.msra.mxu0 %v9047_v60 }
 0x971   :  { %7597 = vmatprep.subr.bf16.mxu0 %v7986_v31 }
 0x974   :  { %7599 = vmatpush3.bf16.msra.mxu0 %v9063_v28 }
 0x975   :  { %7600 = vmatprep.subr.bf16.mxu0 %v7986_v31 }
 0x978   :  { %7602 = vmatpush3.bf16.msra.mxu0 %v9083_v13 }
 0x979   :  { %7603 = vmatprep.subr.bf16.mxu0 %v7986_v31 }
 0x97c   :  { %7605 = vmatpush3.bf16.msra.mxu0 %v9109_v49 }
 0x97d   :  { %7606 = vmatprep.subr.bf16.mxu0 %v7986_v31 }
 0x97f   :  { %6876 = vmatmul.mubr.f32.vlgmr.msra.gmra.mrb[14].mxu0 %v3437_v46 }
 0x980   :  { %7608 = vmatpush3.bf16.msra.mxu0 %v9332_v45  ;;  %6910 = vmatprep.mubr.msk.f32.mxu0 %vm7987_vm1, %v7985_v50 }
 0x981   :  { %7609 = vmatprep.subr.bf16.mxu0 %v7986_v31 }
 0x984   :  { %7611 = vmatpush3.bf16.msra.mxu0 %v9340_v52 }
 0x985   :  { %7612 = vmatprep.subr.bf16.mxu0 %v7986_v31 }
 0x988   :  { %7614 = vmatpush3.bf16.msra.mxu0 %v9350_v11 }
 0x989   :  { %7615 = vmatprep.subr.bf16.mxu0 %v7986_v31 }
 0x98c   :  { %7617 = vmatpush3.bf16.msra.mxu0 %v9358_v16 }
 0x98d   :  { %7618 = vmatprep.subr.bf16.mxu0 %v7986_v31 }
 0x990   :  { %7620 = vmatpush3.bf16.msra.mxu0 %v9366_v62 }
 0x991   :  { %7621 = vmatprep.subr.bf16.mxu0 %v7986_v31 }
 0x994   :  { %7623 = vmatpush3.bf16.msra.mxu0 %v9374_v26 }
 0x995   :  { %7624 = vmatprep.subr.bf16.mxu0 %v7986_v31 }
 0x998   :  { %7626 = vmatpush3.bf16.msra.mxu0 %v9382_v59 }
 0x999   :  { %7627 = vmatprep.subr.bf16.mxu0 %v7986_v31 }
 0x99c   :  { %7629 = vmatpush3.bf16.msra.mxu0 %v9390_v41 }
 0x99d   :  { %7630 = vmatprep.subr.bf16.mxu0 %v7986_v31 }
 0x99f   :  { %6911 = vmatmul.mubr.f32.vlgmr.msra.gmra.mrb[14].mxu0 %v9271_v44 }
 0x9a0   :  { %7632 = vmatpush3.bf16.msra.mxu0 %v9007_v22  ;;  %6945 = vmatprep.mubr.msk.f32.mxu0 %vm7987_vm1, %v7985_v50 }
 0x9a1   :  { %7633 = vmatprep.subr.bf16.mxu0 %v7986_v31 }
 0x9a4   :  { %7635 = vmatpush3.bf16.msra.mxu0 %v9017_v57 }
 0x9a5   :  { %7636 = vmatprep.subr.bf16.mxu0 %v7986_v31 }
 0x9a8   :  { %7638 = vmatpush3.bf16.msra.mxu0 %v9027_v12 }
 0x9a9   :  { %7639 = vmatprep.subr.bf16.mxu0 %v7986_v31 }
 0x9ac   :  { %7641 = vmatpush3.bf16.msra.mxu0 %v9037_v5 }
 0x9ad   :  { %7642 = vmatprep.subr.bf16.mxu0 %v7986_v31 }
 0x9b0   :  { %7644 = vmatpush3.bf16.msra.mxu0 %v9047_v60 }
 0x9b1   :  { %7645 = vmatprep.subr.bf16.mxu0 %v7986_v31 }
 0x9b4   :  { %7647 = vmatpush3.bf16.msra.mxu0 %v9063_v28 }
 0x9b5   :  { %7648 = vmatprep.subr.bf16.mxu0 %v7986_v31 }
 0x9b8   :  { %7650 = vmatpush3.bf16.msra.mxu0 %v9083_v13 }
 0x9b9   :  { %7651 = vmatprep.subr.bf16.mxu0 %v7986_v31 }
 0x9bc   :  { %7653 = vmatpush3.bf16.msra.mxu0 %v9109_v49 }
 0x9bd   :  { %7188 = vmatprep.subr.mxu0 %v7985_v50 }
 0x9bf   :  { %6946 = vmatmul.mubr.f32.vlgmr.msra.gmra.mrb[14].mxu0 %v9271_v44  ;;  %v9428_v44 = vsub.f32 %v4001_v43, %v9421_v47 }
 0x9c0   :  { %7190 = vmatprep.mubr.msk.f32.mxu0 %vm7987_vm1, %v7985_v50  ;;  %7189 = vmatpush3.msra.mxu0 %v9421_v47 }
 0x9c1   :  { %7193 = vmatprep.subr.mxu0 %v7985_v50  ;;  %v9432_v39 = vand.u32 4294901760, %v9428_v44 }
 0x9c3   :  { %v4083_v29 = vsub.f32 %v9428_v44, %v9432_v39 }
 0x9c5   :  { %v9436_v34 = vand.u32 4294901760, %v4083_v29 }
 0xa92   :  { %v3991_v48 = vpop.f32.mrb[14].mxu0 }
 0xa93   :  { %v3995_v56 = vmul.f32 0.001953125, %v3991_v48  ;;  %v6947_v24 = vpop.f32.mrb[15].mxu0 }
 0xa95   :  { %v3998_v53 = vsel %vm1463_vm3, %v3995_v56, 0 }
 0xa96   :  { %v4069_v4 = vand.u32 4294901760, %v3998_v53 }
 0xa98   :  { %v4070_v46 = vsub.f32 %v3998_v53, %v4069_v4 }
 0xa9a   :  { %v4071_v6 = vand.u32 4294901760, %v4070_v46 }
 0xa9c   :  { %v4072_v51 = vsub.f32 %v4070_v46, %v4071_v6 }
 0xa9e   :  { %v4073_v63 = vand.u32 4294901760, %v4072_v51 }
 0xaa0   :  { %6951 = vmatmul.mubr.f32.vlgmr.msra.gmra.mrb[16].mxu1 %v4073_v63 }
 0xaa1   :  { %6954 = vmatpush3.msra.mxu1 %v9436_v34  ;;  %6955 = vmatprep.mubr.msk.f32.mxu1 %vm7987_vm1, %v7985_v50 }
 0xaa2   :  { %6958 = vmatprep.subr.mxu1 %v7985_v50 }
 0xaa8   :  { %6956 = vmatmul.mubr.f32.vlgmr.msra.gmra.mrb[16].mxu1 %v4069_v4 }
 0xaa9   :  { %6959 = vmatpush3.msra.mxu1 %v9428_v44  ;;  %6960 = vmatprep.mubr.msk.f32.mxu1 %vm7987_vm1, %v7985_v50 }
 0xaaa   :  { %6963 = vmatprep.subr.mxu1 %v7985_v50 }
 0xab0   :  { %6961 = vmatmul.mubr.f32.vlgmr.msra.gmra.mrb[16].mxu1 %v4070_v46 }
 0xab1   :  { %6964 = vmatpush3.msra.mxu1 %v9421_v47  ;;  %6965 = vmatprep.mubr.msk.f32.mxu1 %vm7987_vm1, %v7985_v50 }
 0xab2   :  { %6968 = vmatprep.subr.mxu1 %v7985_v50 }
 0xab8   :  { %6966 = vmatmul.mubr.f32.vlgmr.msra.gmra.mrb[16].mxu1 %v4071_v6 }
 0xab9   :  { %6969 = vmatpush3.msra.mxu1 %v9432_v39  ;;  %6970 = vmatprep.mubr.msk.f32.mxu1 %vm7987_vm1, %v7985_v50 }
 0xaba   :  { %6973 = vmatprep.subr.mxu1 %v7985_v50 }
 0xac0   :  { %6971 = vmatmul.mubr.f32.vlgmr.msra.gmra.mrb[16].mxu1 %v4069_v4 }
 0xac1   :  { %6974 = vmatpush3.msra.mxu1 %v9421_v47  ;;  %6975 = vmatprep.mubr.msk.f32.mxu1 %vm7987_vm1, %v7985_v50 }
 0xac2   :  { %7654 = vmatprep.subr.bf16.mxu1 %v7986_v31 }
 0xac8   :  { %6976 = vmatmul.mubr.f32.vlgmr.msra.gmra.mrb[16].mxu1 %v4069_v4 }
 0xac9   :  { %7656 = vmatpush3.bf16.msra.mxu1 %v9007_v22  ;;  %7010 = vmatprep.mubr.msk.f32.mxu1 %vm7987_vm1, %v7985_v50 }
 0xaca   :  { %7657 = vmatprep.subr.bf16.mxu1 %v7986_v31 }
 0xacd   :  { %7659 = vmatpush3.bf16.msra.mxu1 %v9017_v57 }
 0xace   :  { %7660 = vmatprep.subr.bf16.mxu1 %v7986_v31 }
 0xad1   :  { %7662 = vmatpush3.bf16.msra.mxu1 %v9027_v12 }
 0xad2   :  { %7663 = vmatprep.subr.bf16.mxu1 %v7986_v31 }
 0xad5   :  { %7665 = vmatpush3.bf16.msra.mxu1 %v9037_v5 }
 0xad6   :  { %7666 = vmatprep.subr.bf16.mxu1 %v7986_v31 }
 0xad9   :  { %7668 = vmatpush3.bf16.msra.mxu1 %v9047_v60 }
 0xada   :  { %7669 = vmatprep.subr.bf16.mxu1 %v7986_v31 }
 0xadd   :  { %7671 = vmatpush3.bf16.msra.mxu1 %v9063_v28 }
 0xade   :  { %7672 = vmatprep.subr.bf16.mxu1 %v7986_v31 }
 0xae1   :  { %7674 = vmatpush3.bf16.msra.mxu1 %v9083_v13 }
 0xae2   :  { %7675 = vmatprep.subr.bf16.mxu1 %v7986_v31 }
 0xae5   :  { %7677 = vmatpush3.bf16.msra.mxu1 %v9109_v49 }
 0xae6   :  { %7678 = vmatprep.subr.bf16.mxu1 %v7986_v31 }
 0xb9b   :  { %v4445_v0 = vpop.f32.mrb[16].mxu1 }
 0xb9c   :  { %v4452_v20 = vrot.slane %v4445_v0, %v8776_v15  ;;  %v6977_v7 = vpop.f32.mrb[17].mxu1 }
 0xb9e   :  { %v9478_v61 = vsub.f32 %v9265_v37, %v4452_v20  ;;  %v9481_v9 = vsub.f32 %v9267_v38, %v4452_v20 }
 0xba0   :  { %v4455_v10 = vmul.f32 %v9478_v61, %v9478_v61  ;;  %v4456_v36 = vmul.f32 %v9481_v9, %v9481_v9 }
 0xba2   :  { %v4457_v30 = vadd.f32 %v4456_v36, %v4455_v10 }
 0xba4   :  { %v4458_v23 = vrot.slane %v4457_v30, 4 }
 0xba6   :  { %v4459_v17 = vadd.f32 %v4458_v23, %v4457_v30 }
 0xba8   :  { %v4460_v18 = vrot.slane %v4459_v17, 2 }
 0xbaa   :  { %v4461_v32 = vadd.f32 %v4460_v18, %v4459_v17 }
 0xbac   :  { %v4462_v43 = vrot.slane %v4461_v32, 1 }
 0xbae   :  { %v4463_v48 = vadd.f32 %v4462_v43, %v4461_v32 }
 0xbb0   :  { %v9487_v56 = vand.u32 4294901760, %v4463_v48 }
 0xbb2   :  { %v4546_v37 = vsub.f32 %v4463_v48, %v9487_v56 }
 0xbb4   :  { %v4547_v24 = vand.u32 4294901760, %v4546_v37 }
 0xbb6   :  { %v4548_v38 = vsub.f32 %v4546_v37, %v4547_v24 }
 0xbb8   :  { %v4549_v53 = vand.u32 4294901760, %v4548_v38 }
 0xbba   :  { %7011 = vmatmul.mubr.f32.vlgmr.msra.gmra.mrb[18].mxu1 %v4549_v53 }
 0xbbb   :  { %7680 = vmatpush3.bf16.msra.mxu1 %v9125_v54  ;;  %7045 = vmatprep.mubr.msk.f32.mxu1 %vm7987_vm1, %v7985_v50 }
 0xbbc   :  { %7681 = vmatprep.subr.bf16.mxu1 %v7986_v31 }
 0xbbf   :  { %7683 = vmatpush3.bf16.msra.mxu1 %v9139_v35 }
 0xbc0   :  { %7684 = vmatprep.subr.bf16.mxu1 %v7986_v31 }
 0xbc3   :  { %7686 = vmatpush3.bf16.msra.mxu1 %v9153_v21 }
 0xbc4   :  { %7687 = vmatprep.subr.bf16.mxu1 %v7986_v31 }
 0xbc7   :  { %7689 = vmatpush3.bf16.msra.mxu1 %v9179_v58  ;;  %v3329_v58 = vld [vmem:[%s9626_s9 + $0x2] sm:$0x1] }
 0xbc8   :  { %7690 = vmatprep.subr.bf16.mxu1 %v7986_v31 }
 0xbcb   :  { %7692 = vmatpush3.bf16.msra.mxu1 %v9183_v33 }
 0xbcc   :  { %7693 = vmatprep.subr.bf16.mxu1 %v7986_v31 }
 0xbcf   :  { %7695 = vmatpush3.bf16.msra.mxu1 %v9203_v3 }
 0xbd0   :  { %7696 = vmatprep.subr.bf16.mxu1 %v7986_v31 }
 0xbd3   :  { %7698 = vmatpush3.bf16.msra.mxu1 %v9229_v8 }
 0xbd4   :  { %7699 = vmatprep.subr.bf16.mxu1 %v7986_v31 }
 0xbd7   :  { %7701 = vmatpush3.bf16.msra.mxu1 %v9231_v25  ;;  %v5673_v25 = vld [vmem:[%s9626_s9 + $0x3] ss:$0 sm:$0xff] }
 0xbd8   :  { %7702 = vmatprep.subr.bf16.mxu1 %v7986_v31 }
 0xbda   :  { %7046 = vmatmul.mubr.f32.vlgmr.msra.gmra.mrb[18].mxu1 %v9487_v56 }
 0xbdb   :  { %7704 = vmatpush3.bf16.msra.mxu1 %v9235_v55  ;;  %7080 = vmatprep.mubr.msk.f32.mxu1 %vm7987_vm1, %v7985_v50 }
 0xbdc   :  { %7705 = vmatprep.subr.bf16.mxu1 %v7986_v31 }
 0xbdf   :  { %7707 = vmatpush3.bf16.msra.mxu1 %v9239_v19 }
 0xbe0   :  { %7708 = vmatprep.subr.bf16.mxu1 %v7986_v31 }
 0xbe3   :  { %7710 = vmatpush3.bf16.msra.mxu1 %v9243_v27 }
 0xbe4   :  { %7711 = vmatprep.subr.bf16.mxu1 %v7986_v31 }
 0xbe7   :  { %7713 = vmatpush3.bf16.msra.mxu1 %v9247_v1 }
 0xbe8   :  { %7714 = vmatprep.subr.bf16.mxu1 %v7986_v31 }
 0xbeb   :  { %7716 = vmatpush3.bf16.msra.mxu1 %v9251_v40 }
 0xbec   :  { %7717 = vmatprep.subr.bf16.mxu1 %v7986_v31 }
 0xbef   :  { %7719 = vmatpush3.bf16.msra.mxu1 %v9255_v42 }
 0xbf0   :  { %7720 = vmatprep.subr.bf16.mxu1 %v7986_v31 }
 0xbf3   :  { %7722 = vmatpush3.bf16.msra.mxu1 %v9259_v14 }
 0xbf4   :  { %7723 = vmatprep.subr.bf16.mxu1 %v7986_v31 }
 0xbf7   :  { %7725 = vmatpush3.bf16.msra.mxu1 %v9263_v2 }
 0xbf8   :  { %7726 = vmatprep.subr.bf16.mxu1 %v7986_v31 }
 0xbfa   :  { %7081 = vmatmul.mubr.f32.vlgmr.msra.gmra.mrb[18].mxu1 %v4546_v37 }
 0xbfb   :  { %7728 = vmatpush3.bf16.msra.mxu1 %v9007_v22  ;;  %7115 = vmatprep.mubr.msk.f32.mxu1 %vm7987_vm1, %v7985_v50 }
 0xbfc   :  { %7729 = vmatprep.subr.bf16.mxu1 %v7986_v31 }
 0xbff   :  { %7731 = vmatpush3.bf16.msra.mxu1 %v9017_v57 }
 0xc00   :  { %7732 = vmatprep.subr.bf16.mxu1 %v7986_v31 }
 0xc03   :  { %7734 = vmatpush3.bf16.msra.mxu1 %v9027_v12 }
 0xc04   :  { %7735 = vmatprep.subr.bf16.mxu1 %v7986_v31 }
 0xc07   :  { %7737 = vmatpush3.bf16.msra.mxu1 %v9037_v5 }
 0xc08   :  { %7738 = vmatprep.subr.bf16.mxu1 %v7986_v31 }
 0xc0b   :  { %7740 = vmatpush3.bf16.msra.mxu1 %v9047_v60 }
 0xc0c   :  { %7741 = vmatprep.subr.bf16.mxu1 %v7986_v31 }
 0xc0f   :  { %7743 = vmatpush3.bf16.msra.mxu1 %v9063_v28 }
 0xc10   :  { %7744 = vmatprep.subr.bf16.mxu1 %v7986_v31 }
 0xc13   :  { %7746 = vmatpush3.bf16.msra.mxu1 %v9083_v13 }
 0xc14   :  { %7747 = vmatprep.subr.bf16.mxu1 %v7986_v31 }
 0xc17   :  { %7749 = vmatpush3.bf16.msra.mxu1 %v9109_v49 }
 0xc18   :  { %7750 = vmatprep.subr.bf16.mxu1 %v7986_v31 }
 0xc1a   :  { %7116 = vmatmul.mubr.f32.vlgmr.msra.gmra.mrb[18].mxu1 %v4547_v24 }
 0xc1b   :  { %7752 = vmatpush3.bf16.msra.mxu1 %v9332_v45  ;;  %7150 = vmatprep.mubr.msk.f32.mxu1 %vm7987_vm1, %v7985_v50 }
 0xc1c   :  { %7753 = vmatprep.subr.bf16.mxu1 %v7986_v31 }
 0xc1f   :  { %7755 = vmatpush3.bf16.msra.mxu1 %v9340_v52 }
 0xc20   :  { %7756 = vmatprep.subr.bf16.mxu1 %v7986_v31 }
 0xc23   :  { %7758 = vmatpush3.bf16.msra.mxu1 %v9350_v11 }
 0xc24   :  { %7759 = vmatprep.subr.bf16.mxu1 %v7986_v31 }
 0xc27   :  { %7761 = vmatpush3.bf16.msra.mxu1 %v9358_v16 }
 0xc28   :  { %7762 = vmatprep.subr.bf16.mxu1 %v7986_v31 }
 0xc2b   :  { %7764 = vmatpush3.bf16.msra.mxu1 %v9366_v62 }
 0xc2c   :  { %7765 = vmatprep.subr.bf16.mxu1 %v7986_v31 }
 0xc2f   :  { %7767 = vmatpush3.bf16.msra.mxu1 %v9374_v26 }
 0xc30   :  { %7768 = vmatprep.subr.bf16.mxu1 %v7986_v31 }
 0xc33   :  { %7770 = vmatpush3.bf16.msra.mxu1 %v9382_v59 }
 0xc34   :  { %7771 = vmatprep.subr.bf16.mxu1 %v7986_v31 }
 0xc37   :  { %7773 = vmatpush3.bf16.msra.mxu1 %v9390_v41 }
 0xc38   :  { %7774 = vmatprep.subr.bf16.mxu1 %v7986_v31 }
 0xc3a   :  { %7151 = vmatmul.mubr.f32.vlgmr.msra.gmra.mrb[18].mxu1 %v9487_v56 }
 0xc3b   :  { %7776 = vmatpush3.bf16.msra.mxu1 %v9007_v22  ;;  %7185 = vmatprep.mubr.msk.f32.mxu1 %vm7987_vm1, %v7985_v50 }
 0xc3c   :  { %7777 = vmatprep.subr.bf16.mxu1 %v7986_v31 }
 0xc3f   :  { %7779 = vmatpush3.bf16.msra.mxu1 %v9017_v57 }
 0xc40   :  { %7780 = vmatprep.subr.bf16.mxu1 %v7986_v31 }
 0xc43   :  { %7782 = vmatpush3.bf16.msra.mxu1 %v9027_v12 }
 0xc44   :  { %7783 = vmatprep.subr.bf16.mxu1 %v7986_v31 }
 0xc47   :  { %7785 = vmatpush3.bf16.msra.mxu1 %v9037_v5 }
 0xc48   :  { %7786 = vmatprep.subr.bf16.mxu1 %v7986_v31 }
 0xc4b   :  { %7788 = vmatpush3.bf16.msra.mxu1 %v9047_v60 }
 0xc4c   :  { %7789 = vmatprep.subr.bf16.mxu1 %v7986_v31 }
 0xc4f   :  { %7791 = vmatpush3.bf16.msra.mxu1 %v9063_v28 }
 0xc50   :  { %7792 = vmatprep.subr.bf16.mxu1 %v7986_v31 }
 0xc53   :  { %7794 = vmatpush3.bf16.msra.mxu1 %v9083_v13 }
 0xc54   :  { %7795 = vmatprep.subr.bf16.mxu1 %v7986_v31 }
 0xc57   :  { %7797 = vmatpush3.bf16.msra.mxu1 %v9109_v49 }
 0xc5a   :  { %7186 = vmatmul.mubr.f32.vlgmr.msra.gmra.mrb[18].mxu1 %v9487_v56 }
 0xd2d   :  { %v5101_v22 = vpop.f32.mrb[18].mxu1 }
 0xd2e   :  { %v5105_v57 = vmul.f32 0.001953125, %v5101_v22  ;;  %v7187_v12 = vpop.f32.mrb[19].mxu1 }
 0xd30   :  { %v5107_v5 = vsel %vm1463_vm3, %v5105_v57, 0 }
 0xd31   :  { %v5175_v60 = vand.u32 4294901760, %v5107_v5 }
 0xd33   :  { %v5176_v54 = vsub.f32 %v5107_v5, %v5175_v60 }
 0xd35   :  { %v5177_v35 = vand.u32 4294901760, %v5176_v54 }
 0xd37   :  { %v5178_v21 = vsub.f32 %v5176_v54, %v5177_v35 }
 0xd39   :  { %v5179_v28 = vand.u32 4294901760, %v5178_v21 }
 0xd3b   :  { %7191 = vmatmul.mubr.f32.vlgmr.msra.gmra.mrb[20].mxu0 %v5179_v28 }
 0xd3c   :  { %7194 = vmatpush3.msra.mxu0 %v9436_v34  ;;  %7195 = vmatprep.mubr.msk.f32.mxu0 %vm7987_vm1, %v7985_v50 }
 0xd3d   :  { %7198 = vmatprep.subr.mxu0 %v7985_v50 }
 0xd43   :  { %7196 = vmatmul.mubr.f32.vlgmr.msra.gmra.mrb[20].mxu0 %v5175_v60 }
 0xd44   :  { %7199 = vmatpush3.msra.mxu0 %v9428_v44  ;;  %7200 = vmatprep.mubr.msk.f32.mxu0 %vm7987_vm1, %v7985_v50 }
 0xd45   :  { %7203 = vmatprep.subr.mxu0 %v7985_v50 }
 0xd4b   :  { %7201 = vmatmul.mubr.f32.vlgmr.msra.gmra.mrb[20].mxu0 %v5176_v54 }
 0xd4c   :  { %7204 = vmatpush3.msra.mxu0 %v9421_v47  ;;  %7205 = vmatprep.mubr.msk.f32.mxu0 %vm7987_vm1, %v7985_v50 }
 0xd4d   :  { %7208 = vmatprep.subr.mxu0 %v7985_v50 }
 0xd53   :  { %7206 = vmatmul.mubr.f32.vlgmr.msra.gmra.mrb[20].mxu0 %v5177_v35 }
 0xd54   :  { %7209 = vmatpush3.msra.mxu0 %v9432_v39  ;;  %7210 = vmatprep.mubr.msk.f32.mxu0 %vm7987_vm1, %v7985_v50 }
 0xd55   :  { %7213 = vmatprep.subr.mxu0 %v7985_v50 }
 0xd5b   :  { %7211 = vmatmul.mubr.f32.vlgmr.msra.gmra.mrb[20].mxu0 %v5175_v60 }
 0xd5c   :  { %7214 = vmatpush3.msra.mxu0 %v9421_v47  ;;  %7215 = vmatprep.mubr.msk.f32.mxu0 %vm7987_vm1, %v7985_v50 }
 0xd63   :  { %7216 = vmatmul.mubr.f32.vlgmr.msra.gmra.mrb[20].mxu0 %v5175_v60 }
 0xe36   :  { %v5551_v31 = vpop.f32.mrb[20].mxu0 }
 0xe37   :  { %v7799_v13 = vadd.f32 1e-05, %v5551_v31  ;;  %v7217_v49 = vpop.f32.mrb[21].mxu0 }
 0xe39   :  { %7982 = vrsqrt.f32 %v7799_v13 }
 0xe43   :  { %v7983_v33 = vpop.eup %7982 }
 0xe44   :  { %v5556_v3 = vmul.f32 %v7983_v33, %v3329_v58 }
 0xe46   :  { %v5560_v8 = vrot.slane %v5556_v3, %v8776_v15 }
 0xe48   :  { %v5561_v55 = vmul.f32 %v5560_v8, %v9478_v61  ;;  %v5562_v50 = vmul.f32 %v5560_v8, %v9481_v9 }
 0xe4a   :  { %v5567_v19 = vadd.f32 %v5673_v25, %v5561_v55  ;;  %v5568_v27 = vadd.f32 %v5673_v25, %v5562_v50 }
 0xe4c   :  { %vm5569_vm6 = vcmp.gt.f32.partialorder %v5567_v19, 0.0  ;;  %vm5570_vm7 = vcmp.gt.f32.partialorder %v5568_v27, 0.0  ;;  %v5571_v1 = vmul.f32 0.01, %v5567_v19  ;;  %v5572_v40 = vmul.f32 0.01, %v5568_v27 }
 0xe4e   :  { %v5573_v42 = vsel %vm5569_vm6, %v5567_v19, %v5571_v1  ;;  %v5574_v14 = vsel %vm5570_vm7, %v5568_v27, %v5572_v40 }
 0xe4f   :  { %5575 = vst [vmem:[%s9627_s10] sm:$0xff] %v5573_v42  ;;  %5576 = vst [vmem:[%s9627_s10 + $0x8] sm:$0xff] %v5574_v14 }

</bundles_post_ra>
